<compile_context>
chip_gen: v6e
topology: v6e:2x2x1
jax: 0.10.0
libtpu: 0.0.40
codegen_flags: <defaults>
</compile_context>

<pallas_src>
import functools
import math

import jax
import jax.numpy as jnp
from jax.experimental import pallas as pl
from jax.experimental.pallas import tpu as pltpu

# ---------------- configuration (small, consistent with the module) ----------
NUM_STATE_VARS = 2        # e.g. Euler
BC_STATE_DIM   = 2
NUM_CONTROLS   = 2
NX             = 128      # output_dim_per_var == nx
HS             = 64       # hidden_dims_state_branch
H_CTRL         = (64, 128)          # hidden_dims_control
H_FUSION       = (256, 512, 256)    # hidden_dims_fusion

BATCH = 64                # total batch processed by one pallas_call

IN_DIM           = BC_STATE_DIM + NUM_CONTROLS        # 4
STATE_FEAT_DIM   = BC_STATE_DIM * HS                  # 128
CONTROL_FEAT_DIM = H_CTRL[-1]                         # 128
FRONT_DIM        = STATE_FEAT_DIM + H_CTRL[0]         # 192 (state 128 | ctrl-h1 64)
FUSION_IN_DIM    = STATE_FEAT_DIM + CONTROL_FEAT_DIM  # 256
OUT_DIM          = NUM_STATE_VARS * NX                # 256

BIAS_LANES = 512          # = max bias width (H_FUSION[1]); one bias per sublane row
MAX_TILE_B = 256          # MXU-native M on v6e/v7x; only used when batch > 256

_MATMUL_DTYPE = jnp.bfloat16   # MXU-native; f32 accumulation everywhere


def _gelu_exact(x):
    # PyTorch nn.GELU() default = exact erf formulation (computed in f32).
    return 0.5 * x * (1.0 + jax.lax.erf(x * (1.0 / math.sqrt(2.0))))


# --------------------------------- kernel -----------------------------------
def lifting_kernel(
    x_ref,          # [batch, IN_DIM]     f32   (full input, constant block index)
    wfr_ref,        # [4, 192]            bf16  fused front (block-diag)
    wc2_ref,        # [64, 128]           bf16  control MLP layer 2
    wf1s_ref,       # [128, 256]          bf16  fusion L1, state half
    wf1c_ref,       # [128, 256]          bf16  fusion L1, control half
    wf2_ref,        # [256, 512]          bf16  fusion L2
    wf3_ref,        # [512, 256]          bf16  fusion L3
    wf4_ref,        # [256, 256]          bf16  fusion output
    bias_ref,       # [8, 512]            f32   packed biases (one per sublane row)
    out_ref,        # [TILE_B, OUT_DIM]   f32
    *, tile_b,
):
    # ---- single untiled input block: slice this step's rows with pl.ds ----
    row0 = pl.multiple_of(pl.program_id(0) * tile_b, 8)
    x = x_ref[pl.ds(row0, tile_b), :].astype(_MATMUL_DTYPE)        # [TB, 4]

    # ---- unpack lane-padded biases (one tiny DMA for all six vectors) ----
    b_front = bias_ref[0:1, :FRONT_DIM]
    b_c2    = bias_ref[1:2, :CONTROL_FEAT_DIM]
    b_f1    = bias_ref[2:3, :H_FUSION[0]]
    b_f2    = bias_ref[3:4, :H_FUSION[1]]
    b_f3    = bias_ref[4:5, :H_FUSION[2]]
    b_f4    = bias_ref[5:6, :OUT_DIM]

    # ---- fused front end: block-diag [4,192] covers all state branches and
    #      control layer 1 in a single MXU push; one GELU over 192 lanes ----
    front = jnp.dot(x, wfr_ref[...],
                    preferred_element_type=jnp.float32) + b_front
    front = _gelu_exact(front)                                      # [TB, 192] f32

    state_feat = front[:, :STATE_FEAT_DIM]                          # [TB, 128]
    ctrl_h     = front[:, STATE_FEAT_DIM:]                          # [TB, 64]

    # ---- control MLP layer 2 (+ GELU, dropout = identity) ----
    ctrl_feat = jnp.dot(ctrl_h.astype(_MATMUL_DTYPE), wc2_ref[...],
                        preferred_element_type=jnp.float32) + b_c2
    ctrl_feat = _gelu_exact(ctrl_feat)                              # [TB, 128]

    # ---- fusion layer 1 with W_f1 split: no concat materialization;
    #      direct dot+dot sum keeps the add on the MXU result path (v7x MRB) --
    f = (jnp.dot(state_feat.astype(_MATMUL_DTYPE), wf1s_ref[...],
                 preferred_element_type=jnp.float32)
         + jnp.dot(ctrl_feat.astype(_MATMUL_DTYPE), wf1c_ref[...],
                   preferred_element_type=jnp.float32)
         + b_f1)
    f = _gelu_exact(f)                                              # [TB, 256]

    f = jnp.dot(f.astype(_MATMUL_DTYPE), wf2_ref[...],
                preferred_element_type=jnp.float32) + b_f2
    f = _gelu_exact(f)                                              # [TB, 512]

    f = jnp.dot(f.astype(_MATMUL_DTYPE), wf3_ref[...],
                preferred_element_type=jnp.float32) + b_f3
    f = _gelu_exact(f)                                              # [TB, 256]

    out = jnp.dot(f.astype(_MATMUL_DTYPE), wf4_ref[...],
                  preferred_element_type=jnp.float32) + b_f4

    out_ref[...] = out.astype(out_ref.dtype)


# ------------------------------- wrapper -------------------------------------
def _cost_estimate(batch):
    mm = (IN_DIM * FRONT_DIM + H_CTRL[0] * H_CTRL[1]
          + STATE_FEAT_DIM * H_FUSION[0] + CONTROL_FEAT_DIM * H_FUSION[0]
          + H_FUSION[0] * H_FUSION[1] + H_FUSION[1] * H_FUSION[2]
          + H_FUSION[2] * OUT_DIM)
    flops = 2 * batch * mm
    transcendentals = batch * (FRONT_DIM + CONTROL_FEAT_DIM
                               + H_FUSION[0] + H_FUSION[1] + H_FUSION[2])
    weight_bytes = 2 * mm                                   # bf16 weights
    bias_bytes = 4 * 8 * BIAS_LANES                          # packed bias block
    io_bytes = 4 * batch * (IN_DIM + OUT_DIM)
    return pl.CostEstimate(flops=flops, transcendentals=transcendentals,
                           bytes_accessed=weight_bytes + bias_bytes + io_bytes)


def _pick_tile(batch):
    # Single grid step for small batches (per-step overhead dominates there);
    # MXU-native 256-row tiles only once the batch is large enough.
    if batch <= MAX_TILE_B:
        assert batch % 8 == 0, "batch must be a multiple of 8"
        return batch
    assert batch % MAX_TILE_B == 0, "large batch must be a multiple of 256"
    return MAX_TILE_B


@jax.jit
def universal_lifting_forward(bc_ctrl, params):
    """bc_ctrl: [batch, bc_state_dim + num_controls] -> [batch, nsv, nx]."""
    batch = bc_ctrl.shape[0]
    tile_b = _pick_tile(batch)
    grid = (batch // tile_b,)

    weights = (
        params["W_front"],
        params["W_c2"],
        params["W_f1s"], params["W_f1c"],
        params["W_f2"],
        params["W_f3"],
        params["W_f4"],
    )
    bias_pack = params["bias_pack"]          # [8, 512] f32

    # Input passed as one untiled block (constant block index -> one DMA even
    # with grid > 1); weights/biases likewise VMEM-resident across the grid.
    x_spec = pl.BlockSpec((batch, IN_DIM), lambda i: (0, 0))
    weight_specs = [pl.BlockSpec(w.shape, lambda i: (0, 0)) for w in weights]
    bias_spec = pl.BlockSpec(bias_pack.shape, lambda i: (0, 0))
    out_spec = pl.BlockSpec((tile_b, OUT_DIM), lambda i: (i, 0))

    # Keep a small call on ONE TensorCore (splitting would duplicate the
    # ~0.8 MB weight DMA into each core's VMEM); only go "parallel" when each
    # core gets full 256-row tiles.
    dim_sem = ("arbitrary",) if grid[0] == 1 else ("parallel",)

    out = pl.pallas_call(
        functools.partial(lifting_kernel, tile_b=tile_b),
        out_shape=jax.ShapeDtypeStruct((batch, OUT_DIM), jnp.float32),
        grid_spec=pltpu.PrefetchScalarGridSpec(
            num_scalar_prefetch=0,
            grid=grid,
            in_specs=[x_spec] + weight_specs + [bias_spec],
            out_specs=out_spec,
        ),
        compiler_params=pltpu.CompilerParams(dimension_semantics=dim_sem),
        cost_estimate=_cost_estimate(batch),
    )(bc_ctrl, *weights, bias_pack)
    return out.reshape(batch, NUM_STATE_VARS, NX)


# --------------------------- parameter construction ---------------------------
def init_params(key):
    """Deterministic synthetic params matching the PyTorch __init__ shapes.

    Returns a dict containing BOTH the module-layout pieces (used by the
    pure-JAX reference, mirroring the nn.Module exactly) and the fused
    kernel-layout arrays (bf16 weights, one packed f32 bias block).
    """
    ks = list(jax.random.split(key, 32))
    k_iter = iter(ks)

    def lin(in_dim, out_dim):
        kw = next(k_iter)
        kb = next(k_iter)
        bound = 1.0 / math.sqrt(in_dim)
        w = jax.random.uniform(kw, (in_dim, out_dim), jnp.float32, -bound, bound)
        b = jax.random.uniform(kb, (1, out_dim), jnp.float32, -bound, bound)
        return w, b

    # --- module layout: bc_state_dim independent Linear(1, HS) branches ---
    W_state_branches, b_state_branches = [], []
    for _ in range(BC_STATE_DIM):
        w_i, b_i = lin(1, HS)
        W_state_branches.append(w_i)       # [1, HS]
        b_state_branches.append(b_i)       # [1, HS]

    W_c1, b_c1 = lin(NUM_CONTROLS, H_CTRL[0])
    W_c2, b_c2 = lin(H_CTRL[0], H_CTRL[1])

    W_f1, b_f1 = lin(FUSION_IN_DIM, H_FUSION[0])
    W_f2, b_f2 = lin(H_FUSION[0], H_FUSION[1])
    W_f3, b_f3 = lin(H_FUSION[1], H_FUSION[2])
    W_f4, b_f4 = lin(H_FUSION[2], OUT_DIM)

    # --- kernel layout ---
    # Fused front-end weight: block-diagonal over [state branches | control L1].
    W_front = jnp.zeros((IN_DIM, FRONT_DIM), jnp.float32)
    for i in range(BC_STATE_DIM):
        W_front = W_front.at[i, i * HS:(i + 1) * HS].set(W_state_branches[i][0])
    W_front = W_front.at[BC_STATE_DIM:, STATE_FEAT_DIM:].set(W_c1)
    b_front = jnp.concatenate(b_state_branches + [b_c1], axis=-1)   # [1, 192]

    # Split W_f1 to eliminate the in-kernel concat.
    W_f1s = W_f1[:STATE_FEAT_DIM]          # [128, 256]
    W_f1c = W_f1[STATE_FEAT_DIM:]          # [128, 256]

    # Pack all six biases into one sublane-indexed [8, 512] f32 block
    # (one bias per row, lane-padded) -> a single tiny DMA.
    bias_rows = [b_front, b_c2, b_f1, b_f2, b_f3, b_f4]
    bias_pack = jnp.zeros((8, BIAS_LANES), jnp.float32)
    for r, b in enumerate(bias_rows):
        bias_pack = bias_pack.at[r, :b.shape[-1]].set(b[0])

    bf16 = lambda a: a.astype(_MATMUL_DTYPE)
    return dict(
        # kernel-layout (bf16 weights, f32 packed biases)
        W_front=bf16(W_front),
        W_c2=bf16(W_c2),
        W_f1s=bf16(W_f1s), W_f1c=bf16(W_f1c),
        W_f2=bf16(W_f2),
        W_f3=bf16(W_f3),
        W_f4=bf16(W_f4),
        bias_pack=bias_pack,
        # module-layout (f32) for the reference
        W_state_branches=W_state_branches, b_state_branches=b_state_branches,
        W_c1=W_c1, b_c1=b_c1, W_c2_f32=W_c2, b_c2=b_c2,
        W_f1=W_f1, b_f1=b_f1,
        W_f2_f32=W_f2, b_f2=b_f2,
        W_f3_f32=W_f3, b_f3=b_f3,
        W_f4_f32=W_f4, b_f4=b_f4,
    )


# ------------------------------ pure-JAX reference ----------------------------
def reference_forward(bc_ctrl, p):
    """Mirrors the PyTorch module structure (per-branch Linear, concat, fusion).

    Matmul inputs are cast to bf16 with f32 accumulation to match the kernel's
    MXU dtype; GELU/biases stay f32 (same as the kernel)."""
    bf = lambda a: a.astype(_MATMUL_DTYPE)
    dot = functools.partial(jnp.dot, preferred_element_type=jnp.float32)

    bc_state = bc_ctrl[:, :BC_STATE_DIM]
    bc_c = bc_ctrl[:, BC_STATE_DIM:]

    feats = []
    for i in range(BC_STATE_DIM):
        xi = bc_state[:, i:i + 1]
        yi = dot(bf(xi), bf(p["W_state_branches"][i])) + p["b_state_branches"][i]
        feats.append(_gelu_exact(yi))
    state_feat = jnp.concatenate(feats, axis=-1)

    h = _gelu_exact(dot(bf(bc_c), bf(p["W_c1"])) + p["b_c1"])
    h = _gelu_exact(dot(bf(h), bf(p["W_c2_f32"])) + p["b_c2"])

    feat = jnp.concatenate([state_feat, h], axis=-1)
    f = _gelu_exact(dot(bf(feat), bf(p["W_f1"])) + p["b_f1"])
    f = _gelu_exact(dot(bf(f), bf(p["W_f2_f32"])) + p["b_f2"])
    f = _gelu_exact(dot(bf(f), bf(p["W_f3_f32"])) + p["b_f3"])
    out = dot(bf(f), bf(p["W_f4_f32"])) + p["b_f4"]
    return out.reshape(-1, NUM_STATE_VARS, NX)


# ----------------------------------- main -------------------------------------
if __name__ == "__main__":
    key = jax.random.PRNGKey(0)
    k_params, k_input = jax.random.split(key)

    params = init_params(k_params)
    bc_ctrl = jax.random.normal(k_input, (BATCH, IN_DIM), jnp.float32)

    out = universal_lifting_forward(bc_ctrl, params)
    out = jax.block_until_ready(out)

    assert out.shape == (BATCH, NUM_STATE_VARS, NX), out.shape

    ref = reference_forward(bc_ctrl, params)
    err = float(jnp.max(jnp.abs(out - ref)))
    if not (err < 2e-3):
        raise AssertionError(f"mismatch vs reference, max abs err = {err}")

    # TODO(synk): nn.Dropout is identity here (eval semantics); training-mode
    # stochastic dropout would need pltpu.prng_* masks.
    print("KERNEL_OK")
</pallas_src>

<mosaic_0001>
module attributes {stable_mosaic.version = 11 : i64} {
  func.func @lifting_kernel(%arg0: i32, %arg1: memref<64x4xf32, #tpu.memory_space<vmem>>, %arg2: memref<4x192xbf16, #tpu.memory_space<vmem>>, %arg3: memref<64x128xbf16, #tpu.memory_space<vmem>>, %arg4: memref<128x256xbf16, #tpu.memory_space<vmem>>, %arg5: memref<128x256xbf16, #tpu.memory_space<vmem>>, %arg6: memref<256x512xbf16, #tpu.memory_space<vmem>>, %arg7: memref<512x256xbf16, #tpu.memory_space<vmem>>, %arg8: memref<256x256xbf16, #tpu.memory_space<vmem>>, %arg9: memref<8x512xf32, #tpu.memory_space<vmem>>, %arg10: memref<64x256xf32, #tpu.memory_space<vmem>>) attributes {dimension_semantics = [#tpu.dimension_semantics<arbitrary>], iteration_bounds = array<i64: 1>, scalar_prefetch = 0 : i64, scratch_operands = 0 : i64, tpu.core_type = #tpu.core_type<tc>, window_params = [{pipeline_mode = #tpu.pipeline_mode<synchronous>, transform_indices = @transform_0, window_bounds = array<i64: 64, 4>}, {pipeline_mode = #tpu.pipeline_mode<synchronous>, transform_indices = @transform_1, window_bounds = array<i64: 4, 192>}, {pipeline_mode = #tpu.pipeline_mode<synchronous>, transform_indices = @transform_2, window_bounds = array<i64: 64, 128>}, {pipeline_mode = #tpu.pipeline_mode<synchronous>, transform_indices = @transform_3, window_bounds = array<i64: 128, 256>}, {pipeline_mode = #tpu.pipeline_mode<synchronous>, transform_indices = @transform_4, window_bounds = array<i64: 128, 256>}, {pipeline_mode = #tpu.pipeline_mode<synchronous>, transform_indices = @transform_5, window_bounds = array<i64: 256, 512>}, {pipeline_mode = #tpu.pipeline_mode<synchronous>, transform_indices = @transform_6, window_bounds = array<i64: 512, 256>}, {pipeline_mode = #tpu.pipeline_mode<synchronous>, transform_indices = @transform_7, window_bounds = array<i64: 256, 256>}, {pipeline_mode = #tpu.pipeline_mode<synchronous>, transform_indices = @transform_8, window_bounds = array<i64: 8, 512>}, {transform_indices = @transform_9, window_bounds = array<i64: 64, 256>}]} {
    %c64_i32 = arith.constant 64 : i32
    %0 = arith.muli %arg0, %c64_i32 : i32
    %1 = tpu.assume_multiple %0, 8 : i32
    %2 = arith.index_cast %1 : i32 to index
    %c0 = arith.constant 0 : index
    %3 = vector.load %arg1[%2, %c0] : memref<64x4xf32, #tpu.memory_space<vmem>>, vector<64x4xf32>
    %4 = arith.truncf %3 : vector<64x4xf32> to vector<64x4xbf16>
    %c0_0 = arith.constant 0 : index
    %c0_1 = arith.constant 0 : index
    %5 = vector.load %arg9[%c0_0, %c0_1] : memref<8x512xf32, #tpu.memory_space<vmem>>, vector<1x192xf32>
    %c1 = arith.constant 1 : index
    %c0_2 = arith.constant 0 : index
    %6 = vector.load %arg9[%c1, %c0_2] : memref<8x512xf32, #tpu.memory_space<vmem>>, vector<1x128xf32>
    %c2 = arith.constant 2 : index
    %c0_3 = arith.constant 0 : index
    %7 = vector.load %arg9[%c2, %c0_3] : memref<8x512xf32, #tpu.memory_space<vmem>>, vector<1x256xf32>
    %c3 = arith.constant 3 : index
    %c0_4 = arith.constant 0 : index
    %8 = vector.load %arg9[%c3, %c0_4] : memref<8x512xf32, #tpu.memory_space<vmem>>, vector<1x512xf32>
    %c4 = arith.constant 4 : index
    %c0_5 = arith.constant 0 : index
    %9 = vector.load %arg9[%c4, %c0_5] : memref<8x512xf32, #tpu.memory_space<vmem>>, vector<1x256xf32>
    %c5 = arith.constant 5 : index
    %c0_6 = arith.constant 0 : index
    %10 = vector.load %arg9[%c5, %c0_6] : memref<8x512xf32, #tpu.memory_space<vmem>>, vector<1x256xf32>
    %c0_7 = arith.constant 0 : index
    %c0_8 = arith.constant 0 : index
    %11 = vector.load %arg2[%c0_7, %c0_8] : memref<4x192xbf16, #tpu.memory_space<vmem>>, vector<4x192xbf16>
    %cst = arith.constant dense<0.000000e+00> : vector<64x192xf32>
    %12 = tpu.matmul %4, %11, %cst {dimension_numbers = #tpu.dot_dimension_numbers<[1], [0], [0], [1], [0, 0, 1, 1], [], []>} : vector<64x4xbf16>, vector<4x192xbf16>, vector<64x192xf32> -> vector<64x192xf32>
    %13 = vector.broadcast %5 : vector<1x192xf32> to vector<64x192xf32>
    %14 = arith.addf %12, %13 : vector<64x192xf32>
    %cst_9 = arith.constant 5.000000e-01 : f32
    %15 = vector.broadcast %cst_9 : f32 to vector<64x192xf32>
    %16 = arith.mulf %15, %14 : vector<64x192xf32>
    %cst_10 = arith.constant 0.707106769 : f32
    %17 = vector.broadcast %cst_10 : f32 to vector<64x192xf32>
    %18 = arith.mulf %14, %17 : vector<64x192xf32>
    %19 = math.erf %18 : vector<64x192xf32>
    %cst_11 = arith.constant 1.000000e+00 : f32
    %20 = vector.broadcast %cst_11 : f32 to vector<64x192xf32>
    %21 = arith.addf %20, %19 : vector<64x192xf32>
    %22 = arith.mulf %16, %21 : vector<64x192xf32>
    %23 = vector.extract_strided_slice %22 {offsets = [0, 0], sizes = [64, 128], strides = [1, 1]} : vector<64x192xf32> to vector<64x128xf32>
    %24 = vector.extract_strided_slice %22 {offsets = [0, 128], sizes = [64, 64], strides = [1, 1]} : vector<64x192xf32> to vector<64x64xf32>
    %25 = arith.truncf %24 : vector<64x64xf32> to vector<64x64xbf16>
    %c0_12 = arith.constant 0 : index
    %c0_13 = arith.constant 0 : index
    %26 = vector.load %arg3[%c0_12, %c0_13] : memref<64x128xbf16, #tpu.memory_space<vmem>>, vector<64x128xbf16>
    %cst_14 = arith.constant dense<0.000000e+00> : vector<64x128xf32>
    %27 = tpu.matmul %25, %26, %cst_14 {dimension_numbers = #tpu.dot_dimension_numbers<[1], [0], [0], [1], [0, 0, 1, 1], [], []>} : vector<64x64xbf16>, vector<64x128xbf16>, vector<64x128xf32> -> vector<64x128xf32>
    %28 = vector.broadcast %6 : vector<1x128xf32> to vector<64x128xf32>
    %29 = arith.addf %27, %28 : vector<64x128xf32>
    %cst_15 = arith.constant 5.000000e-01 : f32
    %30 = vector.broadcast %cst_15 : f32 to vector<64x128xf32>
    %31 = arith.mulf %30, %29 : vector<64x128xf32>
    %cst_16 = arith.constant 0.707106769 : f32
    %32 = vector.broadcast %cst_16 : f32 to vector<64x128xf32>
    %33 = arith.mulf %29, %32 : vector<64x128xf32>
    %34 = math.erf %33 : vector<64x128xf32>
    %cst_17 = arith.constant 1.000000e+00 : f32
    %35 = vector.broadcast %cst_17 : f32 to vector<64x128xf32>
    %36 = arith.addf %35, %34 : vector<64x128xf32>
    %37 = arith.mulf %31, %36 : vector<64x128xf32>
    %38 = arith.truncf %23 : vector<64x128xf32> to vector<64x128xbf16>
    %c0_18 = arith.constant 0 : index
    %c0_19 = arith.constant 0 : index
    %39 = vector.load %arg4[%c0_18, %c0_19] : memref<128x256xbf16, #tpu.memory_space<vmem>>, vector<128x256xbf16>
    %cst_20 = arith.constant dense<0.000000e+00> : vector<64x256xf32>
    %40 = tpu.matmul %38, %39, %cst_20 {dimension_numbers = #tpu.dot_dimension_numbers<[1], [0], [0], [1], [0, 0, 1, 1], [], []>} : vector<64x128xbf16>, vector<128x256xbf16>, vector<64x256xf32> -> vector<64x256xf32>
    %41 = arith.truncf %37 : vector<64x128xf32> to vector<64x128xbf16>
    %c0_21 = arith.constant 0 : index
    %c0_22 = arith.constant 0 : index
    %42 = vector.load %arg5[%c0_21, %c0_22] : memref<128x256xbf16, #tpu.memory_space<vmem>>, vector<128x256xbf16>
    %cst_23 = arith.constant dense<0.000000e+00> : vector<64x256xf32>
    %43 = tpu.matmul %41, %42, %cst_23 {dimension_numbers = #tpu.dot_dimension_numbers<[1], [0], [0], [1], [0, 0, 1, 1], [], []>} : vector<64x128xbf16>, vector<128x256xbf16>, vector<64x256xf32> -> vector<64x256xf32>
    %44 = arith.addf %40, %43 : vector<64x256xf32>
    %45 = vector.broadcast %7 : vector<1x256xf32> to vector<64x256xf32>
    %46 = arith.addf %44, %45 : vector<64x256xf32>
    %cst_24 = arith.constant 5.000000e-01 : f32
    %47 = vector.broadcast %cst_24 : f32 to vector<64x256xf32>
    %48 = arith.mulf %47, %46 : vector<64x256xf32>
    %cst_25 = arith.constant 0.707106769 : f32
    %49 = vector.broadcast %cst_25 : f32 to vector<64x256xf32>
    %50 = arith.mulf %46, %49 : vector<64x256xf32>
    %51 = math.erf %50 : vector<64x256xf32>
    %cst_26 = arith.constant 1.000000e+00 : f32
    %52 = vector.broadcast %cst_26 : f32 to vector<64x256xf32>
    %53 = arith.addf %52, %51 : vector<64x256xf32>
    %54 = arith.mulf %48, %53 : vector<64x256xf32>
    %55 = arith.truncf %54 : vector<64x256xf32> to vector<64x256xbf16>
    %c0_27 = arith.constant 0 : index
    %c0_28 = arith.constant 0 : index
    %56 = vector.load %arg6[%c0_27, %c0_28] : memref<256x512xbf16, #tpu.memory_space<vmem>>, vector<256x512xbf16>
    %cst_29 = arith.constant dense<0.000000e+00> : vector<64x512xf32>
    %57 = tpu.matmul %55, %56, %cst_29 {dimension_numbers = #tpu.dot_dimension_numbers<[1], [0], [0], [1], [0, 0, 1, 1], [], []>} : vector<64x256xbf16>, vector<256x512xbf16>, vector<64x512xf32> -> vector<64x512xf32>
    %58 = vector.broadcast %8 : vector<1x512xf32> to vector<64x512xf32>
    %59 = arith.addf %57, %58 : vector<64x512xf32>
    %cst_30 = arith.constant 5.000000e-01 : f32
    %60 = vector.broadcast %cst_30 : f32 to vector<64x512xf32>
    %61 = arith.mulf %60, %59 : vector<64x512xf32>
    %cst_31 = arith.constant 0.707106769 : f32
    %62 = vector.broadcast %cst_31 : f32 to vector<64x512xf32>
    %63 = arith.mulf %59, %62 : vector<64x512xf32>
    %64 = math.erf %63 : vector<64x512xf32>
    %cst_32 = arith.constant 1.000000e+00 : f32
    %65 = vector.broadcast %cst_32 : f32 to vector<64x512xf32>
    %66 = arith.addf %65, %64 : vector<64x512xf32>
    %67 = arith.mulf %61, %66 : vector<64x512xf32>
    %68 = arith.truncf %67 : vector<64x512xf32> to vector<64x512xbf16>
    %c0_33 = arith.constant 0 : index
    %c0_34 = arith.constant 0 : index
    %69 = vector.load %arg7[%c0_33, %c0_34] : memref<512x256xbf16, #tpu.memory_space<vmem>>, vector<512x256xbf16>
    %cst_35 = arith.constant dense<0.000000e+00> : vector<64x256xf32>
    %70 = tpu.matmul %68, %69, %cst_35 {dimension_numbers = #tpu.dot_dimension_numbers<[1], [0], [0], [1], [0, 0, 1, 1], [], []>} : vector<64x512xbf16>, vector<512x256xbf16>, vector<64x256xf32> -> vector<64x256xf32>
    %71 = vector.broadcast %9 : vector<1x256xf32> to vector<64x256xf32>
    %72 = arith.addf %70, %71 : vector<64x256xf32>
    %cst_36 = arith.constant 5.000000e-01 : f32
    %73 = vector.broadcast %cst_36 : f32 to vector<64x256xf32>
    %74 = arith.mulf %73, %72 : vector<64x256xf32>
    %cst_37 = arith.constant 0.707106769 : f32
    %75 = vector.broadcast %cst_37 : f32 to vector<64x256xf32>
    %76 = arith.mulf %72, %75 : vector<64x256xf32>
    %77 = math.erf %76 : vector<64x256xf32>
    %cst_38 = arith.constant 1.000000e+00 : f32
    %78 = vector.broadcast %cst_38 : f32 to vector<64x256xf32>
    %79 = arith.addf %78, %77 : vector<64x256xf32>
    %80 = arith.mulf %74, %79 : vector<64x256xf32>
    %81 = arith.truncf %80 : vector<64x256xf32> to vector<64x256xbf16>
    %c0_39 = arith.constant 0 : index
    %c0_40 = arith.constant 0 : index
    %82 = vector.load %arg8[%c0_39, %c0_40] : memref<256x256xbf16, #tpu.memory_space<vmem>>, vector<256x256xbf16>
    %cst_41 = arith.constant dense<0.000000e+00> : vector<64x256xf32>
    %83 = tpu.matmul %81, %82, %cst_41 {dimension_numbers = #tpu.dot_dimension_numbers<[1], [0], [0], [1], [0, 0, 1, 1], [], []>} : vector<64x256xbf16>, vector<256x256xbf16>, vector<64x256xf32> -> vector<64x256xf32>
    %84 = vector.broadcast %10 : vector<1x256xf32> to vector<64x256xf32>
    %85 = arith.addf %83, %84 : vector<64x256xf32>
    %c0_42 = arith.constant 0 : index
    %c0_43 = arith.constant 0 : index
    %86 = vector.load %arg10[%c0_42, %c0_43] : memref<64x256xf32, #tpu.memory_space<vmem>>, vector<64x256xf32>
    tpu.vector_store %arg10[%c0_42, %c0_43], %85 {strides = array<i32>} : memref<64x256xf32, #tpu.memory_space<vmem>>, vector<64x256xf32>,
    return
  }
  func.func @transform_0(%arg0: i32) -> (i32, i32) {
    %c0_i32 = arith.constant 0 : i32
    %c0_i32_0 = arith.constant 0 : i32
    %c0_i32_1 = arith.constant 0 : i32
    return %c0_i32, %c0_i32_0 : i32, i32
  }
  func.func @transform_1(%arg0: i32) -> (i32, i32) {
    %c0_i32 = arith.constant 0 : i32
    %c0_i32_0 = arith.constant 0 : i32
    %c0_i32_1 = arith.constant 0 : i32
    return %c0_i32, %c0_i32_0 : i32, i32
  }
  func.func @transform_2(%arg0: i32) -> (i32, i32) {
    %c0_i32 = arith.constant 0 : i32
    %c0_i32_0 = arith.constant 0 : i32
    %c0_i32_1 = arith.constant 0 : i32
    return %c0_i32, %c0_i32_0 : i32, i32
  }
  func.func @transform_3(%arg0: i32) -> (i32, i32) {
    %c0_i32 = arith.constant 0 : i32
    %c0_i32_0 = arith.constant 0 : i32
    %c0_i32_1 = arith.constant 0 : i32
    return %c0_i32, %c0_i32_0 : i32, i32
  }
  func.func @transform_4(%arg0: i32) -> (i32, i32) {
    %c0_i32 = arith.constant 0 : i32
    %c0_i32_0 = arith.constant 0 : i32
    %c0_i32_1 = arith.constant 0 : i32
    return %c0_i32, %c0_i32_0 : i32, i32
  }
  func.func @transform_5(%arg0: i32) -> (i32, i32) {
    %c0_i32 = arith.constant 0 : i32
    %c0_i32_0 = arith.constant 0 : i32
    %c0_i32_1 = arith.constant 0 : i32
    return %c0_i32, %c0_i32_0 : i32, i32
  }
  func.func @transform_6(%arg0: i32) -> (i32, i32) {
    %c0_i32 = arith.constant 0 : i32
    %c0_i32_0 = arith.constant 0 : i32
    %c0_i32_1 = arith.constant 0 : i32
    return %c0_i32, %c0_i32_0 : i32, i32
  }
  func.func @transform_7(%arg0: i32) -> (i32, i32) {
    %c0_i32 = arith.constant 0 : i32
    %c0_i32_0 = arith.constant 0 : i32
    %c0_i32_1 = arith.constant 0 : i32
    return %c0_i32, %c0_i32_0 : i32, i32
  }
  func.func @transform_8(%arg0: i32) -> (i32, i32) {
    %c0_i32 = arith.constant 0 : i32
    %c0_i32_0 = arith.constant 0 : i32
    %c0_i32_1 = arith.constant 0 : i32
    return %c0_i32, %c0_i32_0 : i32, i32
  }
  func.func @transform_9(%arg0: i32) -> (i32, i32) {
    %c0_i32 = arith.constant 0 : i32
    %c0_i32_0 = arith.constant 0 : i32
    return %arg0, %c0_i32 : i32, i32
  }
}

</mosaic_0001>

<bundles_post_ra>
// kernel: universal_lifting_forward.1
= control target key start
LH: loop header
LB: loop body
LE: loop exit
PB: predicated region body
PF: predicated region fallthrough
CT: control target
= control target key end

     0   :  { %14 = vsyncpa [#allocation3], 0  ;;  %s4040_s0 = inlined_call_operand.vmem [shape: f32[64,4], index: 0, kind: input, shape index: {}]   ;;  %s4041_s1 = inlined_call_operand.vmem [shape: bf16[4,192], index: 1, kind: input, shape index: {}]   ;;  %s4042_s2 = inlined_call_operand.vmem [shape: bf16[64,128], index: 2, kind: input, shape index: {}]   ;;  %s4043_s3 = inlined_call_operand.hbm [shape: bf16[128,256], index: 3, kind: input, shape index: {}]   ;;  %s4044_s4 = inlined_call_operand.hbm [shape: bf16[128,256], index: 4, kind: input, shape index: {}]   ;;  %s4045_s5 = inlined_call_operand.hbm [shape: bf16[256,512], index: 5, kind: input, shape index: {}]   ;;  %s4046_s6 = inlined_call_operand.hbm [shape: bf16[512,256], index: 6, kind: input, shape index: {}]   ;;  %s4047_s7 = inlined_call_operand.hbm [shape: bf16[256,256], index: 7, kind: input, shape index: {}]   ;;  %s4048_s8 = inlined_call_operand.vmem [shape: f32[8,512], index: 8, kind: input, shape index: {}]   ;;  %s4049_s9 = inlined_call_operand.vmem [shape: f32[64,256], index: 9, kind: output, shape index: {}]  }
   0x1   :  { %15 = vsyncpa [#allocation5], 0 }
   0x2   :  { %16 = vsyncpa [#allocation8], 0  ;;  %s3407_s30 = smov [#allocation4]   ;;  %s3408_s11 = smov [#allocation7]  }
   0x3   :  { %s40_s10 = sshll.u32 %s3407_s30, 4  ;;  %s64_s12 = sshll.u32 %s3408_s11, 4  ;;  %s41_s10 = int_to_ptr.vmem [resolvable:$true] %s40_s10  ;;  %s65_s12 = int_to_ptr.vmem [resolvable:$true] %s64_s12 }
   0x4   :  { %s3309_s13 = scalar_lea.vmem %s41_s10, 2048  ;;  %p3314_p1 = scmp.lt.s32.totalorder %s41_s10, %s41_s10 }
   0x5   :  { %p3310_p0 = scmp.ne.s32.totalorder %s41_s10, %s3309_s13  ;;  %p3315_p2 = scmp.lt.s32.totalorder %s3309_s13, %s3309_s13 }
   0x7   :  { %p3316_p3 = por %p3315_p2, %p3314_p1 }
   0x9   :  { %p3317_p4 = pnand %p3316_p3, %p3310_p0 }
   0xb   :  { %3320 = shalt.err (!%p3317_p4)
}
   0xc   :  { %s3409_s14 = smov 128   ;;  %s3410_s15 = smov 8  }
   0xd   :  { %46 = dma.hbm_to_vmem [thread:$0]  %s4044_s4, 2048, %s41_s10, [#allocation5], %s3409_s14, %s3409_s14, %s3410_s15  }
   0xe   :  { %s3329_s18 = scalar_lea.vmem %s65_s12, 8192  ;;  %p3334_p6 = scmp.lt.s32.totalorder %s65_s12, %s65_s12 }
   0xf   :  { %p3330_p5 = scmp.ne.s32.totalorder %s65_s12, %s3329_s18  ;;  %p3335_p7 = scmp.lt.s32.totalorder %s3329_s18, %s3329_s18 }
  0x11   :  { %p3336_p8 = por %p3335_p7, %p3334_p6 }
  0x13   :  { %p3337_p9 = pnand %p3336_p8, %p3330_p5 }
  0x15   :  { %3340 = shalt.err (!%p3337_p9)
}
  0x16   :  { %70 = dma.hbm_to_vmem [thread:$0]  %s4046_s6, 8192, %s65_s12, [#allocation8], %s3409_s14, %s3409_s14, %s3410_s15  }
  0x17   :  { %s3411_s21 = smov [#allocation2]   ;;  %s3412_s23 = smov [#allocation6]  }
  0x18   :  { %s28_s22 = sshll.u32 %s3411_s21, 4  ;;  %s52_s24 = sshll.u32 %s3412_s23, 4  ;;  %s29_s22 = int_to_ptr.vmem [resolvable:$true] %s28_s22  ;;  %s53_s24 = int_to_ptr.vmem [resolvable:$true] %s52_s24 }
  0x19   :  { %s3349_s4 = scalar_lea.vmem %s29_s22, 2048  ;;  %p3354_p11 = scmp.lt.s32.totalorder %s29_s22, %s29_s22 }
  0x1a   :  { %p3350_p10 = scmp.ne.s32.totalorder %s29_s22, %s3349_s4  ;;  %p3355_p12 = scmp.lt.s32.totalorder %s3349_s4, %s3349_s4 }
  0x1c   :  { %p3356_p13 = por %p3355_p12, %p3354_p11 }
  0x1e   :  { %p3357_p0 = pnand %p3356_p13, %p3350_p10 }
  0x20   :  { %3360 = shalt.err (!%p3357_p0)
}
  0x21   :  { %34 = dma.hbm_to_vmem [thread:$0]  %s4043_s3, 2048, %s29_s22, [#allocation3], %s3409_s14, %s3409_s14, %s3410_s15  }
  0x22   :  { %s3369_s6 = scalar_lea.vmem %s53_s24, 8192  ;;  %p3374_p2 = scmp.lt.s32.totalorder %s53_s24, %s53_s24 }
  0x23   :  { %p3370_p1 = scmp.ne.s32.totalorder %s53_s24, %s3369_s6  ;;  %p3375_p3 = scmp.lt.s32.totalorder %s3369_s6, %s3369_s6 }
  0x25   :  { %p3376_p4 = por %p3375_p3, %p3374_p2 }
  0x27   :  { %p3377_p5 = pnand %p3376_p4, %p3370_p1 }
  0x29   :  { %3380 = shalt.err (!%p3377_p5)
}
  0x2a   :  { %s3413_s27 = smov 256   ;;  %s3414_s28 = smov 16  }
  0x2b   :  { %58 = dma.hbm_to_vmem [thread:$0]  %s4045_s5, 8192, %s53_s24, [#allocation5], %s3413_s27, %s3413_s27, %s3414_s28  }
  0x2c   :  { %s3415_s10 = smov [#allocation9]  }
  0x2d   :  { %s76_s11 = sshll.u32 %s3415_s10, 4  ;;  %s77_s11 = int_to_ptr.vmem [resolvable:$true] %s76_s11 }
  0x2e   :  { %s3389_s12 = scalar_lea.vmem %s77_s11, 4096  ;;  %p3394_p7 = scmp.lt.s32.totalorder %s77_s11, %s77_s11 }
  0x2f   :  { %p3390_p6 = scmp.ne.s32.totalorder %s77_s11, %s3389_s12  ;;  %p3395_p8 = scmp.lt.s32.totalorder %s3389_s12, %s3389_s12 }
  0x31   :  { %p3396_p9 = por %p3395_p8, %p3394_p7 }
  0x33   :  { %p3397_p10 = pnand %p3396_p9, %p3390_p6 }
  0x35   :  { %3400 = shalt.err (!%p3397_p10)
}
  0x36   :  { %82 = dma.hbm_to_vmem [thread:$0]  %s4047_s7, 4096, %s77_s11, [#allocation8], %s3409_s14, %s3409_s14, %s3410_s15  }
  0x37   :  { %3401 = dma.done.wait [#allocation3], 2048  }
  0x38   :  { %3402 = vsyncadd [#allocation3], 4294965248 }
  0x39   :  { %3403 = dma.done.wait [#allocation5], 10240  }
  0x3a   :  { %3404 = vsyncadd [#allocation5], 4294957056 }
  0x3b   :  { %3405 = dma.done.wait [#allocation8], 12288  }
  0x3c   :  { %3406 = vsyncadd [#allocation8], 4294955008  ;;  %v3416_v0 = vmov 0   ;;  %vm159_vm0 = vcmask 1041408   ;;  %v103_v2 = vld [vmem:[%s4040_s0] sm:$0xff]  ;;  %v104_v3 = vld [vmem:[%s4040_s0 + $0x8] sm:$0xff]  ;;  %v127_v21 = vlaneseq }
  0x3d   :  { %198 = vmatprep.mubr.bf16.mxu0 %v3416_v0  ;;  %v2593_v1 = vld.sshfl [vmem:[%s4041_s1] sm:$0x33 pattern:$0x76325410]  ;;  %v111_v6 = vpack.c.bf16 %v104_v3, %v103_v2  ;;  %vm146_vm1 = vcmask 31744   ;;  %v105_v7 = vld [vmem:[%s4040_s0 + $0x10] sm:$0xff] }
  0x3e   :  { %v145_v4 = vcombine.high %v2593_v1, %v2593_v1  ;;  %v161_v5 = vsel %vm159_vm0, %v2593_v1, 0  ;;  %v106_v8 = vld [vmem:[%s4040_s0 + $0x18] sm:$0xff]  ;;  %v107_v10 = vld [vmem:[%s4040_s0 + $0x20] sm:$0xff]  ;;  %v108_v11 = vld [vmem:[%s4040_s0 + $0x28] sm:$0xff]  ;;  %v3541_v22 = vshrl.u32 %v127_v21, 7  ;;  %vm355_vm2 = vcmask 523264  }
  0x3f   :  { %v112_v9 = vpack.c.bf16 %v106_v8, %v105_v7  ;;  %v113_v12 = vpack.c.bf16 %v108_v11, %v107_v10  ;;  %v109_v13 = vld [vmem:[%s4040_s0 + $0x30] sm:$0xff]  ;;  %v110_v14 = vld [vmem:[%s4040_s0 + $0x38] sm:$0xff]  ;;  %v2835_v18 = vld [vmem:[%s4042_s2 + $0x8] sm:$0xff]  }
  0x40   :  { %2594 = vmatprep.subr.msk.bf16.mxu0 %vm159_vm0, %v145_v4  ;;  %v114_v15 = vpack.c.bf16 %v110_v14, %v109_v13  ;;  %v2833_v16 = vld [vmem:[%s4042_s2 + $0x18] sm:$0xff]   ;;  %v2834_v17 = vld [vmem:[%s4042_s2 + $0x10] sm:$0xff]   ;;  %v2836_v19 = vld [vmem:[%s4042_s2] sm:$0xff]   ;;  %v3544_v23 = vsub.s32 0, %v3541_v22  ;;  %v3550_v25 = vsub.s32 1, %v3541_v22 }
  0x41   :  { %181 = vmatpush1.bf16.msra.mxu0 %v161_v5  ;;  %2807 = vmatprep.subr.bf16.mxu1 %v2833_v16  ;;  %v2839_v20 = vld [vmem:[#allocation4 + $0x74] ss:$8 sps:$4 sm:$0xff]   ;;  %v115_v24 = vld [vmem:[%s4048_s8] ss:$8 sm:$0x3] }
  0x42   :  { %2808 = vmatpush3.bf16.msra.mxu1 %v2833_v16  ;;  %v3553_v26 = vrot.slane %v115_v24, %v3544_v23  ;;  %v3556_v27 = vrot.slane %v115_v24, %v3550_v25 }
  0x43   :  { %2809 = vmatprep.subr.bf16.mxu1 %v2834_v17 }
  0x44   :  { %2595 = vmatmul.mubr.msk.bf16.vlgmr.msra.gmra.mxu0 %vm146_vm1, %v111_v6 }
  0x45   :  { %208 = vmatprep.mubr.bf16.mxu0 %v3416_v0 }
  0x46   :  { %2810 = vmatpush3.bf16.msra.mxu1 %v2834_v17 }
  0x47   :  { %2811 = vmatprep.subr.bf16.mxu1 %v2835_v18 }
  0x4a   :  { %2812 = vmatpush3.bf16.msra.mxu1 %v2835_v18 }
  0x4b   :  { %2813 = vmatprep.subr.bf16.mxu1 %v2836_v19 }
  0x4c   :  { %2596 = vmatmul.mubr.msk.bf16.gmra.mxu0 %vm146_vm1, %v112_v9 }
  0x4d   :  { %218 = vmatprep.mubr.bf16.mxu0 %v3416_v0 }
  0x4e   :  { %2814 = vmatpush3.bf16.msra.mxu1 %v2836_v19 }
  0x4f   :  { %593 = vmatprep.subr.bf16.mxu1 %v2839_v20 }
  0x54   :  { %2597 = vmatmul.mubr.msk.bf16.gmra.mxu0 %vm146_vm1, %v113_v12 }
  0x55   :  { %228 = vmatprep.mubr.bf16.mxu0 %v3416_v0 }
  0x5c   :  { %2598 = vmatmul.mubr.msk.bf16.gmra.mxu0 %vm146_vm1, %v114_v15 }
 0x104   :  { %v200_v28 = vpop.f32.mrf.mxu0 }
 0x105   :  { %v201_v29 = vadd.f32 %v200_v28, %v3553_v26 }
 0x106   :  { %v202_v30 = vpop.f32.mrf.mxu0 }
 0x107   :  { %v255_v31 = vmul.f32 0.70710677, %v201_v29  ;;  %v203_v32 = vadd.f32 %v202_v30, %v3556_v27  ;;  %v239_v63 = vmul.f32 0.5, %v201_v29 }
 0x108   :  { %v204_v33 = vpop.f32.mrf.mxu0 }
 0x109   :  { %3125 = verf.f32 %v255_v31  ;;  %v256_v34 = vmul.f32 0.70710677, %v203_v32  ;;  %v205_v35 = vadd.f32 %v204_v33, %v3553_v26  ;;  %v240_v14 = vmul.f32 0.5, %v203_v32 }
 0x10a   :  { %v206_v36 = vpop.f32.mrf.mxu0 }
 0x10b   :  { %v257_v37 = vmul.f32 0.70710677, %v205_v35  ;;  %v207_v38 = vadd.f32 %v206_v36, %v3556_v27  ;;  %3127 = verf.f32 %v256_v34  ;;  %v241_v3 = vmul.f32 0.5, %v205_v35 }
 0x10c   :  { %v210_v39 = vpop.f32.mrf.mxu0 }
 0x10d   :  { %3129 = verf.f32 %v257_v37  ;;  %v258_v40 = vmul.f32 0.70710677, %v207_v38  ;;  %v211_v41 = vadd.f32 %v210_v39, %v3553_v26  ;;  %v242_v15 = vmul.f32 0.5, %v207_v38 }
 0x10e   :  { %v212_v42 = vpop.f32.mrf.mxu0 }
 0x10f   :  { %3131 = verf.f32 %v258_v40  ;;  %v259_v43 = vmul.f32 0.70710677, %v211_v41  ;;  %v3564_v44 = vadd.f32 %v212_v42, %v3556_v27  ;;  %v243_v31 = vmul.f32 0.5, %v211_v41 }
 0x110   :  { %v214_v45 = vpop.f32.mrf.mxu0 }
 0x111   :  { %3133 = verf.f32 %v259_v43  ;;  %v260_v46 = vmul.f32 0.70710677, %v3564_v44  ;;  %v215_v47 = vadd.f32 %v214_v45, %v3553_v26  ;;  %v244_v45 = vmul.f32 0.5, %v3564_v44 }
 0x112   :  { %v216_v48 = vpop.f32.mrf.mxu0 }
 0x113   :  { %3135 = verf.f32 %v260_v46  ;;  %v261_v49 = vmul.f32 0.70710677, %v215_v47  ;;  %v217_v50 = vadd.f32 %v216_v48, %v3556_v27  ;;  %v245_v35 = vmul.f32 0.5, %v215_v47 }
 0x114   :  { %v220_v51 = vpop.f32.mrf.mxu0 }
 0x115   :  { %3137 = verf.f32 %v261_v49  ;;  %v262_v52 = vmul.f32 0.70710677, %v217_v50  ;;  %v3570_v53 = vadd.f32 %v220_v51, %v3553_v26  ;;  %v246_v41 = vmul.f32 0.5, %v217_v50 }
 0x116   :  { %v3126_v54 = vpop.eup %3125  ;;  %v222_v55 = vpop.f32.mrf.mxu0 }
 0x117   :  { %3139 = verf.f32 %v262_v52  ;;  %v263_v56 = vmul.f32 0.70710677, %v3570_v53  ;;  %v3574_v57 = vadd.f32 %v222_v55, %v3556_v27  ;;  %v287_v60 = vadd.f32 1.0, %v3126_v54  ;;  %v2837_v55 = vld [vmem:[#allocation4 + $0x70] ss:$8 sps:$4 sm:$0xff]  }
 0x118   :  { %v224_v58 = vpop.f32.mrf.mxu0  ;;  %v3128_v59 = vpop.eup %3127 }
 0x119   :  { %3141 = verf.f32 %v263_v56  ;;  %v3577_v61 = vadd.f32 %v224_v58, %v3553_v26  ;;  %v264_v1 = vmul.f32 0.70710677, %v3574_v57  ;;  %v288_v9 = vadd.f32 1.0, %v3128_v59 }
 0x11a   :  { %v3130_v62 = vpop.eup %3129  ;;  %v226_v2 = vpop.f32.mrf.mxu0  ;;  %v3584_v10 = vmul.f32 %v287_v60, %v239_v63  ;;  %v247_v59 = vmul.f32 0.5, %v3570_v53 }
 0x11b   :  { %v289_v4 = vadd.f32 1.0, %v3130_v62  ;;  %v265_v5 = vmul.f32 0.70710677, %v3577_v61  ;;  %v3582_v6 = vadd.f32 %v226_v2, %v3556_v27  ;;  %3143 = verf.f32 %v264_v1 }
 0x11c   :  { %v3132_v7 = vpop.eup %3131  ;;  %v230_v8 = vpop.f32.mrf.mxu0  ;;  %v304_v29 = vmul.f32 %v288_v9, %v240_v14  ;;  %v249_v62 = vmul.f32 0.5, %v3577_v61  ;;  %v248_v2 = vmul.f32 0.5, %v3574_v57 }
 0x11d   :  { %v3586_v11 = vmul.f32 %v289_v4, %v241_v3  ;;  %3145 = verf.f32 %v265_v5  ;;  %v266_v12 = vmul.f32 0.70710677, %v3582_v6  ;;  %v3590_v16 = vadd.f32 %v230_v8, %v3553_v26 }
 0x11e   :  { %v3134_v13 = vpop.eup %3133  ;;  %v232_v17 = vpop.f32.mrf.mxu0  ;;  %v290_v18 = vadd.f32 1.0, %v3132_v7  ;;  %v250_v5 = vmul.f32 0.5, %v3582_v6 }
 0x11f   :  { %v473_v19 = vpack.c.bf16 %v3586_v11, %v3584_v10  ;;  %3147 = verf.f32 %v266_v12  ;;  %v3595_v20 = vadd.f32 %v232_v17, %v3556_v27  ;;  %v267_v24 = vmul.f32 0.70710677, %v3590_v16  ;;  %v2887_v10 = vld [vmem:[#allocation6 + $0xe4] ss:$16 sps:$4 sm:$0xff]   ;;  %v2890_v11 = vld [vmem:[#allocation6 + $0xec] ss:$16 sps:$4 sm:$0xff]  }
 0x120   :  { %v3136_v21 = vpop.eup %3135  ;;  %v234_v28 = vpop.f32.mrf.mxu0  ;;  %v306_v30 = vmul.f32 %v290_v18, %v242_v15  ;;  %v291_v32 = vadd.f32 1.0, %v3134_v13  ;;  %v251_v18 = vmul.f32 0.5, %v3590_v16  ;;  %v2842_v16 = vld [vmem:[#allocation4 + $0x64] ss:$8 sps:$4 sm:$0xff]   ;;  %1339 = vmatprep.subr.bf16.mxu0 %v2887_v10 }
 0x121   :  { %v268_v33 = vmul.f32 0.70710677, %v3595_v20  ;;  %3149 = verf.f32 %v267_v24  ;;  %v235_v36 = vadd.f32 %v234_v28, %v3553_v26  ;;  %v292_v39 = vadd.f32 1.0, %v3136_v21  ;;  %v2980_v10 = vld [vmem:[#allocation6 + $0x10c] ss:$16 sps:$4 sm:$0xff]  }
 0x122   :  { %v3138_v34 = vpop.eup %3137  ;;  %v236_v37 = vpop.f32.mrf.mxu0  ;;  %v319_v38 = vpack.c.bf16 %v306_v30, %v304_v29  ;;  %v3603_v48 = vmul.f32 %v291_v32, %v243_v31  ;;  %v252_v6 = vmul.f32 0.5, %v3595_v20  ;;  %v2845_v20 = vld [vmem:[#allocation4 + $0x54] ss:$8 sps:$4 sm:$0xff]  }
 0x123   :  { %v293_v40 = vadd.f32 1.0, %v3138_v34  ;;  %3151 = verf.f32 %v268_v33  ;;  %v237_v42 = vadd.f32 %v236_v37, %v3556_v27  ;;  %v269_v46 = vmul.f32 0.70710677, %v235_v36  ;;  %v2843_v37 = vld [vmem:[#allocation4 + $0x50] ss:$8 sps:$4 sm:$0xff]  }
 0x124   :  { %v3140_v43 = vpop.eup %3139  ;;  %2815 = vmatprep.mubr.msk.bf16.mxu1 %vm355_vm2, %v319_v38  ;;  %v308_v52 = vmul.f32 %v292_v39, %v244_v45  ;;  %v253_v21 = vmul.f32 0.5, %v235_v36  ;;  %v2840_v36 = vld [vmem:[#allocation4 + $0x60] ss:$8 sps:$4 sm:$0xff]   ;;  %v2848_v38 = vld [vmem:[#allocation4 + $0x44] ss:$8 sps:$4 sm:$0xff]  }
 0x125   :  { %v3605_v47 = vmul.f32 %v293_v40, %v245_v35  ;;  %v294_v49 = vadd.f32 1.0, %v3140_v43  ;;  %v270_v26 = vmul.f32 0.70710677, %v237_v42  ;;  %3153 = verf.f32 %v269_v46  ;;  %v2846_v39 = vld [vmem:[#allocation4 + $0x40] ss:$8 sps:$4 sm:$0xff]  }
 0x126   :  { %v3142_v51 = vpop.eup %3141  ;;  %v254_v28 = vmul.f32 0.5, %v237_v42  ;;  %v2851_v40 = vld [vmem:[#allocation4 + $0x34] ss:$8 sps:$4 sm:$0xff]   ;;  %v2849_v42 = vld [vmem:[#allocation4 + $0x30] ss:$8 sps:$4 sm:$0xff]  }
 0x127   :  { %v310_v54 = vmul.f32 %v294_v49, %v246_v41  ;;  %3155 = verf.f32 %v270_v26  ;;  %v474_v27 = vpack.c.bf16 %v3605_v47, %v3603_v48  ;;  %v295_v56 = vadd.f32 1.0, %v3142_v51  ;;  %v2854_v43 = vld [vmem:[#allocation4 + $0x24] ss:$8 sps:$4 sm:$0xff]   ;;  %v2852_v45 = vld [vmem:[#allocation4 + $0x20] ss:$8 sps:$4 sm:$0xff]  }
 0x128   :  { %v3144_v44 = vpop.eup %3143  ;;  %v2857_v41 = vld [vmem:[#allocation4 + $0x14] ss:$8 sps:$4 sm:$0xff]   ;;  %v2855_v46 = vld [vmem:[#allocation4 + $0x10] ss:$8 sps:$4 sm:$0xff]   ;;  %v2860_v49 = vld [vmem:[#allocation4 + $0x4] ss:$8 sps:$4 sm:$0xff]  }
 0x129   :  { %v320_v50 = vpack.c.bf16 %v310_v54, %v308_v52  ;;  %v296_v60 = vadd.f32 1.0, %v3144_v44  ;;  %v3613_v3 = vmul.f32 %v295_v56, %v247_v59  ;;  %v2858_v26 = vld [vmem:[#allocation4] ss:$8 sps:$4 sm:$0xff]   ;;  %v2863_v51 = vld [vmem:[#allocation2 + $0x74] ss:$8 sps:$4 sm:$0xff]  }
 0x12a   :  { %v3146_v58 = vpop.eup %3145  ;;  %v116_v54 = vld [vmem:[%s4048_s8 + $0x1] ss:$0 sm:$0xff]  ;;  %v2893_v48 = vld [vmem:[#allocation6 + $0xc4] ss:$16 sps:$4 sm:$0xff]   ;;  %v2896_v47 = vld [vmem:[#allocation6 + $0xcc] ss:$16 sps:$4 sm:$0xff]  }
 0x12b   :  { %v297_v63 = vadd.f32 1.0, %v3146_v58  ;;  %2816 = vmatmul.mubr.msk.bf16.vlgmr.msra.gmra.mxu1 %vm355_vm2, %v320_v50  ;;  %v312_v9 = vmul.f32 %v296_v60, %v248_v2 }
 0x12c   :  { %v3148_v1 = vpop.eup %3147  ;;  %594 = vmatpush1.bf16.msra.mxu1 %v2837_v55 }
 0x12d   :  { %v3615_v4 = vmul.f32 %v297_v63, %v249_v62  ;;  %v298_v7 = vadd.f32 1.0, %v3148_v1  ;;  %595 = vmatprep.subr.bf16.mxu1 %v2842_v16 }
 0x12e   :  { %v3150_v8 = vpop.eup %3149 }
 0x12f   :  { %v314_v53 = vmul.f32 %v298_v7, %v250_v5  ;;  %v475_v61 = vpack.c.bf16 %v3615_v4, %v3613_v3  ;;  %v299_v14 = vadd.f32 1.0, %v3150_v8  ;;  %v2902_v3 = vld [vmem:[#allocation6 + $0xac] ss:$16 sps:$4 sm:$0xff]   ;;  %v2897_v4 = vld [vmem:[#allocation6 + $0xa0] ss:$16 sps:$4 sm:$0xff]  }
 0x130   :  { %v3152_v12 = vpop.eup %3151  ;;  %596 = vmatpush1.bf16.msra.mxu1 %v2840_v36 }
 0x131   :  { %v321_v13 = vpack.c.bf16 %v314_v53, %v312_v9  ;;  %v300_v17 = vadd.f32 1.0, %v3152_v12  ;;  %v3623_v30 = vmul.f32 %v299_v14, %v251_v18  ;;  %597 = vmatprep.subr.bf16.mxu1 %v2845_v20  ;;  %v2861_v20 = vld [vmem:[#allocation2 + $0x70] ss:$8 sps:$4 sm:$0xff]  }
 0x132   :  { %v3154_v15 = vpop.eup %3153 }
 0x133   :  { %2819 = vmatprep.mubr.msk.bf16.mxu1 %vm355_vm2, %v321_v13  ;;  %v301_v24 = vadd.f32 1.0, %v3154_v15  ;;  %v316_v32 = vmul.f32 %v300_v17, %v252_v6 }
 0x134   :  { %v3156_v57 = vpop.eup %3155  ;;  %598 = vmatpush1.bf16.msra.mxu1 %v2843_v37 }
 0x135   :  { %v302_v29 = vadd.f32 1.0, %v3156_v57  ;;  %v3625_v31 = vmul.f32 %v301_v24, %v253_v21  ;;  %599 = vmatprep.subr.bf16.mxu1 %v2848_v38 }
 0x137   :  { %v318_v33 = vmul.f32 %v302_v29, %v254_v28  ;;  %v476_v34 = vpack.c.bf16 %v3625_v31, %v3623_v30  ;;  %v2905_v30 = vld [vmem:[#allocation6 + $0x84] ss:$16 sps:$4 sm:$0xff]   ;;  %v2908_v31 = vld [vmem:[#allocation6 + $0x8c] ss:$16 sps:$4 sm:$0xff]  }
 0x138   :  { %600 = vmatpush1.bf16.msra.mxu1 %v2846_v39  ;;  %v2866_v39 = vld [vmem:[#allocation2 + $0x64] ss:$8 sps:$4 sm:$0xff]  }
 0x139   :  { %v322_v35 = vpack.c.bf16 %v318_v33, %v316_v32  ;;  %601 = vmatprep.subr.bf16.mxu1 %v2851_v40 }
 0x13b   :  { %2820 = vmatmul.mubr.msk.bf16.gmra.mxu1 %vm355_vm2, %v322_v35 }
 0x13c   :  { %625 = vmatprep.mubr.bf16.mxu1 %v3416_v0  ;;  %602 = vmatpush1.bf16.msra.mxu1 %v2849_v42 }
 0x13d   :  { %603 = vmatprep.subr.bf16.mxu1 %v2854_v43  ;;  %v2864_v43 = vld [vmem:[#allocation2 + $0x60] ss:$8 sps:$4 sm:$0xff]  }
 0x140   :  { %604 = vmatpush1.bf16.msra.mxu1 %v2852_v45 }
 0x141   :  { %605 = vmatprep.subr.bf16.mxu1 %v2857_v41 }
 0x144   :  { %606 = vmatpush1.bf16.msra.mxu1 %v2855_v46  ;;  %v2869_v46 = vld [vmem:[#allocation2 + $0x54] ss:$8 sps:$4 sm:$0xff]  }
 0x145   :  { %607 = vmatprep.subr.bf16.mxu1 %v2860_v49 }
 0x148   :  { %608 = vmatpush1.bf16.msra.mxu1 %v2858_v26  ;;  %v2867_v26 = vld [vmem:[#allocation2 + $0x50] ss:$8 sps:$4 sm:$0xff]  }
 0x149   :  { %746 = vmatprep.subr.bf16.mxu1 %v2863_v51 }
 0x1eb   :  { %v2817_v52 = vpop.f32.mrf.mxu1 }
 0x1ec   :  { %v411_v60 = vadd.f32 %v2817_v52, %v116_v54 }
 0x1ed   :  { %v402_v55 = vpop.f32.mrf.mxu1 }
 0x1ee   :  { %v403_v44 = vadd.f32 %v402_v55, %v116_v54  ;;  %v443_v2 = vmul.f32 0.70710677, %v411_v60  ;;  %v435_v45 = vmul.f32 0.5, %v411_v60  ;;  %v2875_v60 = vld [vmem:[#allocation2 + $0x34] ss:$8 sps:$4 sm:$0xff]  }
 0x1ef   :  { %v2818_v50 = vpop.f32.mrf.mxu1 }
 0x1f0   :  { %v441_v56 = vmul.f32 0.70710677, %v403_v44  ;;  %v414_v58 = vadd.f32 %v2818_v50, %v116_v54  ;;  %v433_v21 = vmul.f32 0.5, %v403_v44  ;;  %v2870_v50 = vld [vmem:[#allocation2 + $0x40] ss:$8 sps:$4 sm:$0xff]  }
 0x1f1   :  { %v405_v59 = vpop.f32.mrf.mxu1 }
 0x1f2   :  { %3157 = verf.f32 %v441_v56  ;;  %v406_v62 = vadd.f32 %v405_v59, %v116_v54  ;;  %v444_v63 = vmul.f32 0.70710677, %v414_v58  ;;  %v436_v42 = vmul.f32 0.5, %v414_v58 }
 0x1f4   :  { %v442_v1 = vmul.f32 0.70710677, %v406_v62  ;;  %v434_v24 = vmul.f32 0.5, %v406_v62 }
 0x1f6   :  { %3159 = verf.f32 %v442_v1 }
 0x1f7   :  { %3161 = verf.f32 %v444_v63 }
 0x1f8   :  { %3163 = verf.f32 %v443_v2 }
 0x1fb   :  { %v2821_v5 = vpop.f32.mrf.mxu1 }
 0x1fc   :  { %v3634_v17 = vadd.f32 %v2821_v5, %v116_v54  ;;  %v2873_v5 = vld [vmem:[#allocation2 + $0x30] ss:$8 sps:$4 sm:$0xff]  }
 0x1fd   :  { %v418_v7 = vpop.f32.mrf.mxu1 }
 0x1fe   :  { %v419_v8 = vadd.f32 %v418_v7, %v116_v54  ;;  %v447_v16 = vmul.f32 0.70710677, %v3634_v17 }
 0x1ff   :  { %v3158_v9 = vpop.eup %3157  ;;  %v2822_v53 = vpop.f32.mrf.mxu1 }
 0x200   :  { %v445_v12 = vmul.f32 0.70710677, %v419_v8  ;;  %v430_v13 = vadd.f32 %v2822_v53, %v116_v54  ;;  %v457_v15 = vadd.f32 1.0, %v3158_v9  ;;  %v437_v56 = vmul.f32 0.5, %v419_v8  ;;  %v2878_v53 = vld [vmem:[#allocation2 + $0x24] ss:$8 sps:$4 sm:$0xff]  }
 0x201   :  { %v421_v14 = vpop.f32.mrf.mxu1  ;;  %v439_v8 = vmul.f32 0.5, %v3634_v17  ;;  %v2894_v17 = vld [vmem:[#allocation6 + $0xc8] ss:$16 sps:$4 sm:$0xff]  }
 0x202   :  { %v422_v57 = vadd.f32 %v421_v14, %v116_v54  ;;  %3165 = verf.f32 %v445_v12  ;;  %v448_v28 = vmul.f32 0.70710677, %v430_v13  ;;  %v465_v33 = vmul.f32 %v457_v15, %v433_v21  ;;  %v2872_v54 = vld [vmem:[#allocation2 + $0x44] ss:$8 sps:$4 sm:$0xff]   ;;  %v2876_v15 = vld [vmem:[#allocation2 + $0x20] ss:$8 sps:$4 sm:$0xff]  }
 0x203   :  { %v3160_v18 = vpop.eup %3159  ;;  %v440_v14 = vmul.f32 0.5, %v430_v13  ;;  %v2888_v13 = vld [vmem:[#allocation6 + $0xe8] ss:$16 sps:$4 sm:$0xff]  }
 0x204   :  { %v458_v6 = vadd.f32 1.0, %v3160_v18  ;;  %v446_v29 = vmul.f32 0.70710677, %v422_v57  ;;  %v3162_v32 = vpop.eup %3161  ;;  %v438_v58 = vmul.f32 0.5, %v422_v57  ;;  %v2881_v18 = vld [vmem:[#allocation2 + $0x14] ss:$8 sps:$4 sm:$0xff]  }
 0x205   :  { %v3164_v36 = vpop.eup %3163  ;;  %v460_v37 = vadd.f32 1.0, %v3162_v32  ;;  %v2906_v32 = vld [vmem:[#allocation6 + $0x88] ss:$16 sps:$4 sm:$0xff]  }
 0x206   :  { %v466_v35 = vmul.f32 %v458_v6, %v434_v24  ;;  %3167 = verf.f32 %v446_v29  ;;  %v459_v40 = vadd.f32 1.0, %v3164_v36  ;;  %v2879_v24 = vld [vmem:[#allocation2 + $0x10] ss:$8 sps:$4 sm:$0xff]   ;;  %v2882_v29 = vld [vmem:[#allocation2] ss:$8 sps:$4 sm:$0xff]  }
 0x207   :  { %3169 = verf.f32 %v448_v28  ;;  %v468_v41 = vmul.f32 %v460_v37, %v436_v42  ;;  %v2884_v28 = vld [vmem:[#allocation2 + $0x4] ss:$8 sps:$4 sm:$0xff]   ;;  %v2912_v36 = vld [vmem:[#allocation6 + $0x68] ss:$16 sps:$4 sm:$0xff]  }
 0x208   :  { %v493_v38 = vpack.c.bf16 %v466_v35, %v465_v33  ;;  %3171 = verf.f32 %v447_v16  ;;  %v467_v49 = vmul.f32 %v459_v40, %v435_v45  ;;  %v2911_v33 = vld [vmem:[#allocation6 + $0x64] ss:$16 sps:$4 sm:$0xff]   ;;  %v2914_v35 = vld [vmem:[#allocation6 + $0x6c] ss:$16 sps:$4 sm:$0xff]   ;;  %v2909_v16 = vld [vmem:[#allocation6 + $0x60] ss:$16 sps:$4 sm:$0xff]  }
 0x209   :  { %v2920_v37 = vld [vmem:[#allocation6 + $0x4c] ss:$16 sps:$4 sm:$0xff]   ;;  %v2923_v40 = vld [vmem:[#allocation6 + $0x24] ss:$16 sps:$4 sm:$0xff]   ;;  %v2924_v45 = vld [vmem:[#allocation6 + $0x28] ss:$16 sps:$4 sm:$0xff]  }
 0x20a   :  { %626 = vmatmul.mubr.bf16.vlgmr.msra.gmra.mxu1 %v493_v38  ;;  %v494_v52 = vpack.c.bf16 %v468_v41, %v467_v49  ;;  %v2915_v38 = vld [vmem:[#allocation6 + $0x40] ss:$16 sps:$4 sm:$0xff]   ;;  %v2926_v42 = vld [vmem:[#allocation6 + $0x2c] ss:$16 sps:$4 sm:$0xff]   ;;  %v2929_v41 = vld [vmem:[#allocation6 + $0x4] ss:$16 sps:$4 sm:$0xff]  }
 0x20b   :  { %747 = vmatpush1.bf16.msra.mxu1 %v2861_v20  ;;  %635 = vmatprep.mubr.bf16.mxu1 %v3416_v0  ;;  %v2917_v20 = vld [vmem:[#allocation6 + $0x44] ss:$16 sps:$4 sm:$0xff]   ;;  %v2927_v49 = vld [vmem:[#allocation6] ss:$16 sps:$4 sm:$0xff]  }
 0x20c   :  { %748 = vmatprep.subr.bf16.mxu1 %v2866_v39  ;;  %v2918_v39 = vld [vmem:[#allocation6 + $0x48] ss:$16 sps:$4 sm:$0xff]  }
 0x20f   :  { %749 = vmatpush1.bf16.msra.mxu1 %v2864_v43  ;;  %v3166_v51 = vpop.eup %3165  ;;  %v2921_v43 = vld [vmem:[#allocation6 + $0x20] ss:$16 sps:$4 sm:$0xff]  }
 0x210   :  { %750 = vmatprep.subr.bf16.mxu1 %v2869_v46  ;;  %v461_v55 = vadd.f32 1.0, %v3166_v51  ;;  %v2932_v46 = vld [vmem:[#allocation6 + $0xc] ss:$16 sps:$4 sm:$0xff]   ;;  %v2935_v51 = vld [vmem:[#allocation6 + $0x1e4] ss:$16 sps:$4 sm:$0xff]  }
 0x212   :  { %636 = vmatmul.mubr.bf16.gmra.mxu1 %v494_v52  ;;  %v469_v63 = vmul.f32 %v461_v55, %v437_v56  ;;  %v2938_v52 = vld [vmem:[#allocation6 + $0x1ec] ss:$16 sps:$4 sm:$0xff]   ;;  %v2936_v55 = vld [vmem:[#allocation6 + $0x1e8] ss:$16 sps:$4 sm:$0xff]   ;;  %v2939_v56 = vld [vmem:[#allocation6 + $0x1c0] ss:$16 sps:$4 sm:$0xff]  }
 0x213   :  { %v3168_v44 = vpop.eup %3167  ;;  %751 = vmatpush1.bf16.msra.mxu1 %v2867_v26  ;;  %645 = vmatprep.mubr.bf16.mxu1 %v3416_v0  ;;  %v2930_v26 = vld [vmem:[#allocation6 + $0x8] ss:$16 sps:$4 sm:$0xff]  }
 0x214   :  { %v462_v59 = vadd.f32 1.0, %v3168_v44  ;;  %752 = vmatprep.subr.bf16.mxu1 %v2872_v54  ;;  %v3170_v62 = vpop.eup %3169  ;;  %v2933_v54 = vld [vmem:[#allocation6 + $0x1e0] ss:$16 sps:$4 sm:$0xff]   ;;  %v2941_v44 = vld [vmem:[#allocation6 + $0x1c4] ss:$16 sps:$4 sm:$0xff]  }
 0x215   :  { %v3172_v2 = vpop.eup %3171  ;;  %v464_v7 = vadd.f32 1.0, %v3170_v62  ;;  %v2945_v62 = vld [vmem:[#allocation6 + $0x1a0] ss:$16 sps:$4 sm:$0xff]  }
 0x216   :  { %v470_v1 = vmul.f32 %v462_v59, %v438_v58  ;;  %v463_v12 = vadd.f32 1.0, %v3172_v2  ;;  %v2942_v58 = vld [vmem:[#allocation6 + $0x1c8] ss:$16 sps:$4 sm:$0xff]   ;;  %v2947_v59 = vld [vmem:[#allocation6 + $0x1a4] ss:$16 sps:$4 sm:$0xff]  }
 0x217   :  { %753 = vmatpush1.bf16.msra.mxu1 %v2870_v50  ;;  %v472_v57 = vmul.f32 %v464_v7, %v440_v14  ;;  %v2944_v50 = vld [vmem:[#allocation6 + $0x1cc] ss:$16 sps:$4 sm:$0xff]   ;;  %v2954_v7 = vld [vmem:[#allocation6 + $0x188] ss:$16 sps:$4 sm:$0xff]  }
 0x218   :  { %754 = vmatprep.subr.bf16.mxu1 %v2875_v60  ;;  %v495_v9 = vpack.c.bf16 %v470_v1, %v469_v63  ;;  %v471_v21 = vmul.f32 %v463_v12, %v439_v8  ;;  %v2950_v60 = vld [vmem:[#allocation6 + $0x1ac] ss:$16 sps:$4 sm:$0xff]   ;;  %v2948_v63 = vld [vmem:[#allocation6 + $0x1a8] ss:$16 sps:$4 sm:$0xff]   ;;  %v2953_v1 = vld [vmem:[#allocation6 + $0x184] ss:$16 sps:$4 sm:$0xff]  }
 0x219   :  { %v2956_v2 = vld [vmem:[#allocation6 + $0x18c] ss:$16 sps:$4 sm:$0xff]   ;;  %v2957_v12 = vld [vmem:[#allocation6 + $0x160] ss:$16 sps:$4 sm:$0xff]   ;;  %v2960_v14 = vld [vmem:[#allocation6 + $0x168] ss:$16 sps:$4 sm:$0xff]  }
 0x21a   :  { %646 = vmatmul.mubr.bf16.gmra.mxu1 %v495_v9  ;;  %v496_v6 = vpack.c.bf16 %v472_v57, %v471_v21  ;;  %v2959_v9 = vld [vmem:[#allocation6 + $0x164] ss:$16 sps:$4 sm:$0xff]   ;;  %v2968_v8 = vld [vmem:[#allocation6 + $0x14c] ss:$16 sps:$4 sm:$0xff]   ;;  %v2963_v57 = vld [vmem:[#allocation6 + $0x140] ss:$16 sps:$4 sm:$0xff]  }
 0x21b   :  { %755 = vmatpush1.bf16.msra.mxu1 %v2873_v5  ;;  %655 = vmatprep.mubr.bf16.mxu1 %v3416_v0  ;;  %v2951_v5 = vld [vmem:[#allocation6 + $0x180] ss:$16 sps:$4 sm:$0xff]   ;;  %v2971_v21 = vld [vmem:[#allocation6 + $0x124] ss:$16 sps:$4 sm:$0xff]  }
 0x21c   :  { %756 = vmatprep.subr.bf16.mxu1 %v2878_v53  ;;  %v2962_v53 = vld [vmem:[#allocation6 + $0x16c] ss:$16 sps:$4 sm:$0xff]  }
 0x21f   :  { %757 = vmatpush1.bf16.msra.mxu1 %v2876_v15  ;;  %v2965_v15 = vld [vmem:[#allocation6 + $0x144] ss:$16 sps:$4 sm:$0xff]  }
 0x220   :  { %758 = vmatprep.subr.bf16.mxu1 %v2881_v18  ;;  %v2966_v18 = vld [vmem:[#allocation6 + $0x148] ss:$16 sps:$4 sm:$0xff]  }
 0x222   :  { %656 = vmatmul.mubr.bf16.gmra.mxu1 %v496_v6  ;;  %v2969_v6 = vld [vmem:[#allocation6 + $0x120] ss:$16 sps:$4 sm:$0xff]  }
 0x223   :  { %759 = vmatpush1.bf16.msra.mxu1 %v2879_v24  ;;  %778 = vmatprep.mubr.bf16.mxu1 %v3416_v0  ;;  %v2974_v24 = vld [vmem:[#allocation6 + $0x12c] ss:$16 sps:$4 sm:$0xff]  }
 0x224   :  { %760 = vmatprep.subr.bf16.mxu1 %v2884_v28  ;;  %v2972_v28 = vld [vmem:[#allocation6 + $0x128] ss:$16 sps:$4 sm:$0xff]  }
 0x227   :  { %761 = vmatpush1.bf16.msra.mxu1 %v2882_v29  ;;  %v2977_v29 = vld [vmem:[#allocation6 + $0x104] ss:$16 sps:$4 sm:$0xff]  }
 0x228   :  { %1412 = vmatprep.subr.bf16.mxu1 %v2890_v11  ;;  %v2975_v11 = vld [vmem:[#allocation6 + $0x100] ss:$16 sps:$4 sm:$0xff]  }
 0x22a   :  { %779 = vmatmul.mubr.bf16.vlgmr.msra.gmra.mxu1 %v473_v19  ;;  %v2885_v19 = vld [vmem:[#allocation6 + $0xe0] ss:$16 sps:$4 sm:$0xff]  }
 0x22b   :  { %788 = vmatprep.mubr.bf16.mxu1 %v3416_v0  ;;  %1340 = vmatpush1.bf16.msra.mxu0 %v2885_v19  ;;  %v2978_v19 = vld [vmem:[#allocation6 + $0x108] ss:$16 sps:$4 sm:$0xff]  }
 0x22c   :  { %1413 = vmatpush1.bf16.msra.mxu1 %v2888_v13  ;;  %1341 = vmatprep.subr.bf16.mxu0 %v2893_v48  ;;  %v2983_v13 = vld [vmem:[#allocation7 + $0x74] ss:$8 sps:$4 sm:$0xff]  }
 0x22d   :  { %1414 = vmatprep.subr.bf16.mxu1 %v2896_v47  ;;  %v2986_v48 = vld [vmem:[#allocation7 + $0x174] ss:$8 sps:$4 sm:$0xff]  }
 0x230   :  { %1415 = vmatpush1.bf16.msra.mxu1 %v2894_v17 }
 0x231   :  { %1416 = vmatprep.subr.bf16.mxu1 %v2902_v3 }
 0x232   :  { %789 = vmatmul.mubr.bf16.gmra.mxu1 %v474_v27  ;;  %v2891_v27 = vld [vmem:[#allocation6 + $0xc0] ss:$16 sps:$4 sm:$0xff]  }
 0x233   :  { %798 = vmatprep.mubr.bf16.mxu1 %v3416_v0  ;;  %1342 = vmatpush1.bf16.msra.mxu0 %v2891_v27 }
 0x23a   :  { %799 = vmatmul.mubr.bf16.gmra.mxu1 %v475_v61  ;;  %v2900_v61 = vld [vmem:[#allocation6 + $0xa8] ss:$16 sps:$4 sm:$0xff]  }
 0x23b   :  { %808 = vmatprep.mubr.bf16.mxu1 %v3416_v0  ;;  %v2899_v0 = vld [vmem:[#allocation6 + $0xa4] ss:$16 sps:$4 sm:$0xff]   ;;  %1417 = vmatpush1.bf16.msra.mxu1 %v2900_v61 }
 0x23c   :  { %1343 = vmatprep.subr.bf16.mxu0 %v2899_v0  ;;  %1418 = vmatprep.subr.bf16.mxu1 %v2908_v31 }
 0x23d   :  { %1344 = vmatpush1.bf16.msra.mxu0 %v2897_v4 }
 0x23e   :  { %1345 = vmatprep.subr.bf16.mxu0 %v2905_v30 }
 0x23f   :  { %1419 = vmatpush1.bf16.msra.mxu1 %v2906_v32 }
 0x240   :  { %1420 = vmatprep.subr.bf16.mxu1 %v2914_v35 }
 0x242   :  { %809 = vmatmul.mubr.bf16.gmra.mxu1 %v476_v34  ;;  %v2903_v34 = vld [vmem:[#allocation6 + $0x80] ss:$16 sps:$4 sm:$0xff]  }
 0x243   :  { %1346 = vmatpush1.bf16.msra.mxu0 %v2903_v34  ;;  %1421 = vmatpush1.bf16.msra.mxu1 %v2912_v36 }
 0x244   :  { %1347 = vmatprep.subr.bf16.mxu0 %v2911_v33  ;;  %1422 = vmatprep.subr.bf16.mxu1 %v2920_v37 }
 0x247   :  { %1348 = vmatpush1.bf16.msra.mxu0 %v2909_v16  ;;  %1423 = vmatpush1.bf16.msra.mxu1 %v2918_v39 }
 0x248   :  { %1349 = vmatprep.subr.bf16.mxu0 %v2917_v20  ;;  %1424 = vmatprep.subr.bf16.mxu1 %v2926_v42  ;;  %v2589_v20 = vld [vmem:[%s4048_s8 + $0x2] ss:$8 sm:$0x3] }
 0x249   :  { %v3674_v42 = vrot.slane %v2589_v20, %v3550_v25 }
 0x24b   :  { %1350 = vmatpush1.bf16.msra.mxu0 %v2915_v38  ;;  %1425 = vmatpush1.bf16.msra.mxu1 %v2924_v45  ;;  %v3671_v38 = vrot.slane %v2589_v20, %v3544_v23 }
 0x24c   :  { %1351 = vmatprep.subr.bf16.mxu0 %v2923_v40  ;;  %1426 = vmatprep.subr.bf16.mxu1 %v2932_v46 }
 0x24f   :  { %1352 = vmatpush1.bf16.msra.mxu0 %v2921_v43  ;;  %1427 = vmatpush1.bf16.msra.mxu1 %v2930_v26 }
 0x250   :  { %1353 = vmatprep.subr.bf16.mxu0 %v2929_v41  ;;  %1428 = vmatprep.subr.bf16.mxu1 %v2938_v52 }
 0x253   :  { %1354 = vmatpush1.bf16.msra.mxu0 %v2927_v49  ;;  %1429 = vmatpush2.bf16.msra.mxu1 %v2936_v55 }
 0x254   :  { %1355 = vmatprep.subr.bf16.mxu0 %v2935_v51  ;;  %1430 = vmatprep.subr.bf16.mxu1 %v2944_v50 }
 0x257   :  { %1356 = vmatpush2.bf16.msra.mxu0 %v2933_v54  ;;  %1431 = vmatpush2.bf16.msra.mxu1 %v2942_v58 }
 0x258   :  { %1357 = vmatprep.subr.bf16.mxu0 %v2941_v44  ;;  %1432 = vmatprep.subr.bf16.mxu1 %v2950_v60 }
 0x25b   :  { %1358 = vmatpush2.bf16.msra.mxu0 %v2939_v56  ;;  %1433 = vmatpush2.bf16.msra.mxu1 %v2948_v63 }
 0x25c   :  { %1359 = vmatprep.subr.bf16.mxu0 %v2947_v59  ;;  %1434 = vmatprep.subr.bf16.mxu1 %v2956_v2 }
 0x25f   :  { %1360 = vmatpush2.bf16.msra.mxu0 %v2945_v62  ;;  %1435 = vmatpush2.bf16.msra.mxu1 %v2954_v7 }
 0x260   :  { %1361 = vmatprep.subr.bf16.mxu0 %v2953_v1  ;;  %1436 = vmatprep.subr.bf16.mxu1 %v2962_v53 }
 0x263   :  { %1362 = vmatpush2.bf16.msra.mxu0 %v2951_v5  ;;  %1437 = vmatpush2.bf16.msra.mxu1 %v2960_v14 }
 0x264   :  { %1363 = vmatprep.subr.bf16.mxu0 %v2959_v9  ;;  %1438 = vmatprep.subr.bf16.mxu1 %v2968_v8 }
 0x267   :  { %1364 = vmatpush2.bf16.msra.mxu0 %v2957_v12  ;;  %1439 = vmatpush2.bf16.msra.mxu1 %v2966_v18 }
 0x268   :  { %1365 = vmatprep.subr.bf16.mxu0 %v2965_v15  ;;  %1440 = vmatprep.subr.bf16.mxu1 %v2974_v24 }
 0x26b   :  { %1366 = vmatpush2.bf16.msra.mxu0 %v2963_v57  ;;  %1441 = vmatpush2.bf16.msra.mxu1 %v2972_v28 }
 0x26c   :  { %1367 = vmatprep.subr.bf16.mxu0 %v2971_v21  ;;  %1442 = vmatprep.subr.bf16.mxu1 %v2980_v10 }
 0x26f   :  { %1368 = vmatpush2.bf16.msra.mxu0 %v2969_v6  ;;  %1443 = vmatpush2.bf16.msra.mxu1 %v2978_v19 }
 0x270   :  { %1369 = vmatprep.subr.bf16.mxu0 %v2977_v29  ;;  %2129 = vmatprep.subr.bf16.mxu1 %v2986_v48 }
 0x273   :  { %1370 = vmatpush2.bf16.msra.mxu0 %v2975_v11 }
 0x274   :  { %2056 = vmatprep.subr.bf16.mxu0 %v2983_v13 }
 0x2ca   :  { %v627_v47 = vpop.f32.mrf.mxu1 }
 0x2cc   :  { %v629_v27 = vpop.f32.mrf.mxu1 }
 0x2ce   :  { %v631_v17 = vpop.f32.mrf.mxu1 }
 0x2d0   :  { %v633_v0 = vpop.f32.mrf.mxu1 }
 0x2d2   :  { %v637_v3 = vpop.f32.mrf.mxu1 }
 0x2d4   :  { %v639_v4 = vpop.f32.mrf.mxu1 }
 0x2d6   :  { %v641_v61 = vpop.f32.mrf.mxu1 }
 0x2d8   :  { %v643_v30 = vpop.f32.mrf.mxu1 }
 0x2da   :  { %v647_v31 = vpop.f32.mrf.mxu1 }
 0x2dc   :  { %v649_v34 = vpop.f32.mrf.mxu1 }
 0x2de   :  { %v651_v32 = vpop.f32.mrf.mxu1 }
 0x2e0   :  { %v3657_v33 = vpop.f32.mrf.mxu1 }
 0x2e2   :  { %v3659_v35 = vpop.f32.mrf.mxu1 }
 0x2e4   :  { %v3661_v16 = vpop.f32.mrf.mxu1 }
 0x2e6   :  { %v3663_v36 = vpop.f32.mrf.mxu1 }
 0x2e8   :  { %v3668_v37 = vpop.f32.mrf.mxu1 }
 0x2ea   :  { %v780_v39 = vpop.f32.mrf.mxu1 }
 0x2eb   :  { %v781_v40 = vadd.f32 %v780_v39, %v627_v47 }
 0x2ec   :  { %v782_v43 = vpop.f32.mrf.mxu1 }
 0x2ed   :  { %v3677_v45 = vadd.f32 %v3671_v38, %v781_v40  ;;  %v783_v41 = vadd.f32 %v782_v43, %v629_v27 }
 0x2ee   :  { %v784_v46 = vpop.f32.mrf.mxu1 }
 0x2ef   :  { %v862_v49 = vmul.f32 0.70710677, %v3677_v45  ;;  %v831_v26 = vadd.f32 %v3674_v42, %v783_v41  ;;  %v785_v51 = vadd.f32 %v784_v46, %v631_v17 }
 0x2f0   :  { %v786_v52 = vpop.f32.mrf.mxu1 }
 0x2f1   :  { %v863_v54 = vmul.f32 0.70710677, %v831_v26  ;;  %v832_v55 = vadd.f32 %v3671_v38, %v785_v51  ;;  %v787_v44 = vadd.f32 %v786_v52, %v633_v0  ;;  %3173 = verf.f32 %v862_v49 }
 0x2f2   :  { %v790_v50 = vpop.f32.mrf.mxu1 }
 0x2f3   :  { %v864_v56 = vmul.f32 0.70710677, %v832_v55  ;;  %v791_v58 = vadd.f32 %v790_v50, %v637_v3  ;;  %3175 = verf.f32 %v863_v54  ;;  %v833_v59 = vadd.f32 %v3674_v42, %v787_v44 }
 0x2f4   :  { %v792_v60 = vpop.f32.mrf.mxu1  ;;  %v846_v54 = vmul.f32 0.5, %v3677_v45 }
 0x2f5   :  { %3177 = verf.f32 %v864_v56  ;;  %v3684_v62 = vadd.f32 %v3671_v38, %v791_v58  ;;  %v793_v63 = vadd.f32 %v792_v60, %v639_v4  ;;  %v865_v1 = vmul.f32 0.70710677, %v833_v59 }
 0x2f6   :  { %v794_v2 = vpop.f32.mrf.mxu1 }
 0x2f7   :  { %v866_v5 = vmul.f32 0.70710677, %v3684_v62  ;;  %v3688_v7 = vadd.f32 %v3674_v42, %v793_v63  ;;  %v795_v9 = vadd.f32 %v794_v2, %v641_v61  ;;  %3179 = verf.f32 %v865_v1 }
 0x2f8   :  { %v796_v53 = vpop.f32.mrf.mxu1 }
 0x2f9   :  { %v867_v12 = vmul.f32 0.70710677, %v3688_v7  ;;  %v3692_v14 = vadd.f32 %v3671_v38, %v795_v9  ;;  %v797_v15 = vadd.f32 %v796_v53, %v643_v30  ;;  %3181 = verf.f32 %v866_v5 }
 0x2fa   :  { %v800_v8 = vpop.f32.mrf.mxu1  ;;  %v847_v30 = vmul.f32 0.5, %v831_v26  ;;  %v849_v26 = vmul.f32 0.5, %v833_v59 }
 0x2fb   :  { %v868_v57 = vmul.f32 0.70710677, %v3692_v14  ;;  %v801_v18 = vadd.f32 %v800_v8, %v647_v31  ;;  %3183 = verf.f32 %v867_v12  ;;  %v3696_v21 = vadd.f32 %v3674_v42, %v797_v15  ;;  %v2981_v12 = vld [vmem:[#allocation7 + $0x70] ss:$8 sps:$4 sm:$0xff]  }
 0x2fc   :  { %v802_v24 = vpop.f32.mrf.mxu1  ;;  %v848_v31 = vmul.f32 0.5, %v832_v55  ;;  %v2984_v15 = vld [vmem:[#allocation7 + $0x170] ss:$8 sps:$4 sm:$0xff]  }
 0x2fd   :  { %3185 = verf.f32 %v868_v57  ;;  %v3699_v6 = vadd.f32 %v3671_v38, %v801_v18  ;;  %v803_v28 = vadd.f32 %v802_v24, %v649_v34  ;;  %v869_v29 = vmul.f32 0.70710677, %v3696_v21  ;;  %v2989_v18 = vld [vmem:[#allocation7 + $0x64] ss:$8 sps:$4 sm:$0xff]  }
 0x2fe   :  { %v804_v10 = vpop.f32.mrf.mxu1  ;;  %v3174_v19 = vpop.eup %3173  ;;  %v2992_v24 = vld [vmem:[#allocation7 + $0x164] ss:$8 sps:$4 sm:$0xff]  }
 0x2ff   :  { %v3703_v11 = vadd.f32 %v3674_v42, %v803_v28  ;;  %3187 = verf.f32 %v869_v29  ;;  %v805_v13 = vadd.f32 %v804_v10, %v651_v32  ;;  %v870_v27 = vmul.f32 0.70710677, %v3699_v6 }
 0x300   :  { %v806_v48 = vpop.f32.mrf.mxu1  ;;  %v3176_v47 = vpop.eup %3175  ;;  %v894_v46 = vadd.f32 1.0, %v3174_v19 }
 0x301   :  { %v871_v17 = vmul.f32 0.70710677, %v3703_v11  ;;  %v3708_v3 = vadd.f32 %v3671_v38, %v805_v13  ;;  %v807_v4 = vadd.f32 %v806_v48, %v3657_v33  ;;  %v895_v43 = vadd.f32 1.0, %v3176_v47  ;;  %v2987_v13 = vld [vmem:[#allocation7 + $0x60] ss:$8 sps:$4 sm:$0xff]  }
 0x302   :  { %v3178_v0 = vpop.eup %3177  ;;  %v810_v61 = vpop.f32.mrf.mxu1  ;;  %v910_v59 = vmul.f32 %v894_v46, %v846_v54  ;;  %v853_v48 = vmul.f32 0.5, %v3696_v21  ;;  %v2993_v21 = vld [vmem:[#allocation7 + $0x50] ss:$8 sps:$4 sm:$0xff]   ;;  %v855_v54 = vmul.f32 0.5, %v3703_v11 }
 0x303   :  { %v896_v34 = vadd.f32 1.0, %v3178_v0  ;;  %v811_v20 = vadd.f32 %v810_v61, %v3659_v35  ;;  %3189 = verf.f32 %v871_v17  ;;  %v872_v32 = vmul.f32 0.70710677, %v3708_v3  ;;  %v2995_v0 = vld [vmem:[#allocation7 + $0x54] ss:$8 sps:$4 sm:$0xff]  }
 0x304   :  { %v3714_v39 = vadd.f32 %v3674_v42, %v807_v4  ;;  %v812_v40 = vpop.f32.mrf.mxu1  ;;  %v3180_v41 = vpop.eup %3179  ;;  %3191 = verf.f32 %v870_v27  ;;  %v911_v60 = vmul.f32 %v895_v43, %v847_v30  ;;  %v2990_v27 = vld [vmem:[#allocation7 + $0x160] ss:$8 sps:$4 sm:$0xff]   ;;  %v850_v17 = vmul.f32 0.5, %v3684_v62  ;;  %v2998_v4 = vld [vmem:[#allocation7 + $0x154] ss:$8 sps:$4 sm:$0xff]  }
 0x305   :  { %v3717_v49 = vadd.f32 %v3671_v38, %v811_v20  ;;  %v813_v33 = vadd.f32 %v812_v40, %v3661_v16  ;;  %3193 = verf.f32 %v872_v32  ;;  %v897_v52 = vadd.f32 1.0, %v3180_v41  ;;  %v2996_v32 = vld [vmem:[#allocation7 + $0x150] ss:$8 sps:$4 sm:$0xff]   ;;  %v3001_v62 = vld [vmem:[#allocation7 + $0x44] ss:$8 sps:$4 sm:$0xff]  }
 0x306   :  { %v873_v35 = vmul.f32 0.70710677, %v3714_v39  ;;  %v814_v51 = vpop.f32.mrf.mxu1  ;;  %v912_v55 = vmul.f32 %v896_v34, %v848_v31  ;;  %v3182_v50 = vpop.eup %3181  ;;  %v3004_v41 = vld [vmem:[#allocation7 + $0x144] ss:$8 sps:$4 sm:$0xff]   ;;  %v3005_v11 = vld [vmem:[#allocation7 + $0x30] ss:$8 sps:$4 sm:$0xff]  }
 0x307   :  { %v3723_v44 = vadd.f32 %v3674_v42, %v813_v33  ;;  %v815_v56 = vadd.f32 %v814_v51, %v3663_v36  ;;  %v913_v63 = vmul.f32 %v897_v52, %v849_v26  ;;  %v874_v1 = vmul.f32 0.70710677, %v3717_v49  ;;  %v2999_v52 = vld [vmem:[#allocation7 + $0x40] ss:$8 sps:$4 sm:$0xff]  }
 0x308   :  { %3195 = verf.f32 %v873_v35  ;;  %v816_v58 = vpop.f32.mrf.mxu1  ;;  %v3184_v16 = vpop.eup %3183  ;;  %v926_v8 = vpack.c.bf16 %v912_v55, %v910_v59  ;;  %v898_v19 = vadd.f32 1.0, %v3182_v50  ;;  %v856_v35 = vmul.f32 0.5, %v3708_v3 }
 0x309   :  { %v875_v2 = vmul.f32 0.70710677, %v3723_v44  ;;  %v817_v5 = vadd.f32 %v816_v58, %v3668_v37  ;;  %v3730_v9 = vadd.f32 %v3671_v38, %v815_v56  ;;  %v927_v53 = vpack.c.bf16 %v913_v63, %v911_v60  ;;  %v3002_v56 = vld [vmem:[#allocation7 + $0x140] ss:$8 sps:$4 sm:$0xff]   ;;  %v3007_v63 = vld [vmem:[#allocation7 + $0x34] ss:$8 sps:$4 sm:$0xff]  }
 0x30a   :  { %v3186_v45 = vpop.eup %3185  ;;  %v899_v37 = vadd.f32 1.0, %v3184_v16  ;;  %v852_v38 = vmul.f32 0.5, %v3692_v14  ;;  %v914_v34 = vmul.f32 %v898_v19, %v850_v17  ;;  %v857_v55 = vmul.f32 0.5, %v3714_v39  ;;  %v3010_v16 = vld [vmem:[#allocation7 + $0x134] ss:$8 sps:$4 sm:$0xff]  }
 0x30b   :  { %3197 = verf.f32 %v875_v2  ;;  %v3733_v36 = vadd.f32 %v3674_v42, %v817_v5  ;;  %v900_v57 = vadd.f32 1.0, %v3186_v45  ;;  %v876_v28 = vmul.f32 0.70710677, %v3730_v9  ;;  %1371 = vmatprep.mubr.bf16.mxu0 %v927_v53  ;;  %1444 = vmatprep.mubr.bf16.mxu1 %v927_v53  ;;  %v3008_v39 = vld [vmem:[#allocation7 + $0x130] ss:$8 sps:$4 sm:$0xff]  }
 0x30c   :  { %v3188_v29 = vpop.eup %3187  ;;  %3199 = verf.f32 %v874_v1  ;;  %1372 = vmatmul.mubr.bf16.vlgmr.msra.gmra.mxu0 %v926_v8  ;;  %1445 = vmatmul.mubr.bf16.vlgmr.msra.gmra.mxu1 %v926_v8  ;;  %v851_v42 = vmul.f32 0.5, %v3688_v7  ;;  %v854_v58 = vmul.f32 0.5, %v3699_v6  ;;  %v3013_v6 = vld [vmem:[#allocation7 + $0x24] ss:$8 sps:$4 sm:$0xff]   ;;  %v3014_v19 = vld [vmem:[#allocation7 + $0x120] ss:$8 sps:$4 sm:$0xff]  }
 0x30d   :  { %v877_v10 = vmul.f32 0.70710677, %v3733_v36  ;;  %3201 = verf.f32 %v876_v28  ;;  %v901_v47 = vadd.f32 1.0, %v3188_v29  ;;  %2057 = vmatpush1.bf16.msra.mxu0 %v2981_v12  ;;  %2130 = vmatpush1.bf16.msra.mxu1 %v2984_v15  ;;  %v916_v14 = vmul.f32 %v900_v57, %v852_v38  ;;  %v3016_v8 = vld [vmem:[#allocation7 + $0x124] ss:$8 sps:$4 sm:$0xff]  }
 0x30e   :  { %2058 = vmatprep.subr.bf16.mxu0 %v2989_v18  ;;  %2131 = vmatprep.subr.bf16.mxu1 %v2992_v24  ;;  %v915_v61 = vmul.f32 %v899_v37, %v851_v42  ;;  %v859_v18 = vmul.f32 0.5, %v3723_v44  ;;  %v860_v28 = vmul.f32 0.5, %v3730_v9  ;;  %v861_v37 = vmul.f32 0.5, %v3733_v36  ;;  %v3017_v36 = vld [vmem:[#allocation7 + $0x10] ss:$8 sps:$4 sm:$0xff]  }
 0x30f   :  { %3203 = verf.f32 %v877_v10  ;;  %v917_v30 = vmul.f32 %v901_v47, %v853_v48  ;;  %v928_v43 = vpack.c.bf16 %v916_v14, %v914_v34  ;;  %v3011_v10 = vld [vmem:[#allocation7 + $0x20] ss:$8 sps:$4 sm:$0xff]   ;;  %v3019_v47 = vld [vmem:[#allocation7 + $0x14] ss:$8 sps:$4 sm:$0xff]   ;;  %v3020_v14 = vld [vmem:[#allocation7 + $0x110] ss:$8 sps:$4 sm:$0xff]  }
 0x310   :  { %v3190_v31 = vpop.eup %3189  ;;  %v3034_v34 = vld [vmem:[#allocation7 + $0x1f4] ss:$8 sps:$4 sm:$0xff]  }
 0x311   :  { %v3192_v7 = vpop.eup %3191  ;;  %v929_v20 = vpack.c.bf16 %v917_v30, %v915_v61  ;;  %2059 = vmatpush1.bf16.msra.mxu0 %v2987_v13  ;;  %2132 = vmatpush1.bf16.msra.mxu1 %v2990_v27  ;;  %v903_v46 = vadd.f32 1.0, %v3190_v31  ;;  %v858_v13 = vmul.f32 0.5, %v3717_v49  ;;  %v3022_v27 = vld [vmem:[#allocation7 + $0x114] ss:$8 sps:$4 sm:$0xff]   ;;  %v3028_v61 = vld [vmem:[#allocation7 + $0x104] ss:$8 sps:$4 sm:$0xff]  }
 0x312   :  { %v3194_v40 = vpop.eup %3193  ;;  %2060 = vmatprep.subr.bf16.mxu0 %v2995_v0  ;;  %2133 = vmatprep.subr.bf16.mxu1 %v2998_v4  ;;  %v902_v51 = vadd.f32 1.0, %v3192_v7  ;;  %v3025_v4 = vld [vmem:[#allocation7 + $0x4] ss:$8 sps:$4 sm:$0xff]   ;;  %v3023_v49 = vld [vmem:[#allocation7] ss:$8 sps:$4 sm:$0xff]  }
 0x313   :  { %1381 = vmatprep.mubr.bf16.mxu0 %v929_v20  ;;  %1454 = vmatprep.mubr.bf16.mxu1 %v929_v20  ;;  %v904_v33 = vadd.f32 1.0, %v3194_v40  ;;  %v919_v59 = vmul.f32 %v903_v46, %v855_v54  ;;  %v3026_v30 = vld [vmem:[#allocation7 + $0x100] ss:$8 sps:$4 sm:$0xff]   ;;  %v3031_v31 = vld [vmem:[#allocation7 + $0xf4] ss:$8 sps:$4 sm:$0xff]  }
 0x314   :  { %1382 = vmatmul.mubr.bf16.gmra.mxu0 %v928_v43  ;;  %1455 = vmatmul.mubr.bf16.gmra.mxu1 %v928_v43  ;;  %v918_v2 = vmul.f32 %v902_v51, %v854_v58  ;;  %v3029_v7 = vld [vmem:[#allocation7 + $0xf0] ss:$8 sps:$4 sm:$0xff]   ;;  %v3035_v40 = vld [vmem:[#allocation7 + $0xe0] ss:$8 sps:$4 sm:$0xff]   ;;  %v3055_v54 = vld [vmem:[#allocation7 + $0xb4] ss:$8 sps:$4 sm:$0xff]  }
 0x315   :  { %v3196_v26 = vpop.eup %3195  ;;  %2061 = vmatpush1.bf16.msra.mxu0 %v2993_v21  ;;  %2134 = vmatpush1.bf16.msra.mxu1 %v2996_v32  ;;  %v920_v60 = vmul.f32 %v904_v33, %v856_v35  ;;  %v3032_v20 = vld [vmem:[#allocation7 + $0x1f0] ss:$8 sps:$4 sm:$0xff]   ;;  %v3037_v21 = vld [vmem:[#allocation7 + $0xe4] ss:$8 sps:$4 sm:$0xff]   ;;  %v3038_v43 = vld [vmem:[#allocation7 + $0x1e0] ss:$8 sps:$4 sm:$0xff]  }
 0x316   :  { %v905_v50 = vadd.f32 1.0, %v3196_v26  ;;  %2062 = vmatprep.subr.bf16.mxu0 %v3001_v62  ;;  %2135 = vmatprep.subr.bf16.mxu1 %v3004_v41  ;;  %v3040_v32 = vld [vmem:[#allocation7 + $0x1e4] ss:$8 sps:$4 sm:$0xff]   ;;  %v3043_v62 = vld [vmem:[#allocation7 + $0xd4] ss:$8 sps:$4 sm:$0xff]  }
 0x317   :  { %v930_v12 = vpack.c.bf16 %v920_v60, %v918_v2  ;;  %v3046_v41 = vld [vmem:[#allocation7 + $0x1d4] ss:$8 sps:$4 sm:$0xff]   ;;  %v3041_v46 = vld [vmem:[#allocation7 + $0xd0] ss:$8 sps:$4 sm:$0xff]   ;;  %v3049_v26 = vld [vmem:[#allocation7 + $0xc4] ss:$8 sps:$4 sm:$0xff]  }
 0x318   :  { %v3198_v3 = vpop.eup %3197  ;;  %v921_v1 = vmul.f32 %v905_v50, %v857_v55  ;;  %v3044_v33 = vld [vmem:[#allocation7 + $0x1d0] ss:$8 sps:$4 sm:$0xff]   ;;  %v3052_v35 = vld [vmem:[#allocation7 + $0x1c4] ss:$8 sps:$4 sm:$0xff]   ;;  %v3047_v51 = vld [vmem:[#allocation7 + $0xc0] ss:$8 sps:$4 sm:$0xff]  }
 0x319   :  { %v3200_v5 = vpop.eup %3199  ;;  %2063 = vmatpush1.bf16.msra.mxu0 %v2999_v52  ;;  %2136 = vmatpush1.bf16.msra.mxu1 %v3002_v56  ;;  %v907_v15 = vadd.f32 1.0, %v3198_v3  ;;  %v3050_v52 = vld [vmem:[#allocation7 + $0x1c0] ss:$8 sps:$4 sm:$0xff]   ;;  %v3058_v55 = vld [vmem:[#allocation7 + $0x1b4] ss:$8 sps:$4 sm:$0xff]  }
 0x31a   :  { %v931_v45 = vpack.c.bf16 %v921_v1, %v919_v59  ;;  %v3202_v53 = vpop.eup %3201  ;;  %2064 = vmatprep.subr.bf16.mxu0 %v3007_v63  ;;  %2137 = vmatprep.subr.bf16.mxu1 %v3010_v16  ;;  %v906_v38 = vadd.f32 1.0, %v3200_v5  ;;  %v3053_v50 = vld [vmem:[#allocation7 + $0xb0] ss:$8 sps:$4 sm:$0xff]   ;;  %v3061_v58 = vld [vmem:[#allocation7 + $0xa4] ss:$8 sps:$4 sm:$0xff]  }
 0x31b   :  { %v908_v24 = vadd.f32 1.0, %v3202_v53  ;;  %v923_v42 = vmul.f32 %v907_v15, %v859_v18  ;;  %v3056_v56 = vld [vmem:[#allocation7 + $0x1b0] ss:$8 sps:$4 sm:$0xff]   ;;  %v3064_v60 = vld [vmem:[#allocation7 + $0x1a4] ss:$8 sps:$4 sm:$0xff]   ;;  %v1009_v15 = vsub.s32 2, %v3541_v22 }
 0x31c   :  { %v3204_v57 = vpop.eup %3203  ;;  %1391 = vmatprep.mubr.bf16.mxu0 %v931_v45  ;;  %1464 = vmatprep.mubr.bf16.mxu1 %v931_v45  ;;  %v922_v17 = vmul.f32 %v906_v38, %v858_v13  ;;  %v3059_v63 = vld [vmem:[#allocation7 + $0xa0] ss:$8 sps:$4 sm:$0xff]   ;;  %v3067_v3 = vld [vmem:[#allocation7 + $0x94] ss:$8 sps:$4 sm:$0xff]   ;;  %v3065_v1 = vld [vmem:[#allocation7 + $0x90] ss:$8 sps:$4 sm:$0xff]  }
 0x31d   :  { %1392 = vmatmul.mubr.bf16.gmra.mxu0 %v930_v12  ;;  %1465 = vmatmul.mubr.bf16.gmra.mxu1 %v930_v12  ;;  %v909_v29 = vadd.f32 1.0, %v3204_v57  ;;  %v924_v44 = vmul.f32 %v908_v24, %v860_v28  ;;  %v3062_v16 = vld [vmem:[#allocation7 + $0x1a0] ss:$8 sps:$4 sm:$0xff]   ;;  %v3070_v59 = vld [vmem:[#allocation7 + $0x194] ss:$8 sps:$4 sm:$0xff]   ;;  %v1013_v18 = vsub.s32 3, %v3541_v22 }
 0x31e   :  { %2065 = vmatpush1.bf16.msra.mxu0 %v3005_v11  ;;  %2138 = vmatpush1.bf16.msra.mxu1 %v3008_v39  ;;  %v3068_v2 = vld [vmem:[#allocation7 + $0x190] ss:$8 sps:$4 sm:$0xff]   ;;  %v3073_v5 = vld [vmem:[#allocation7 + $0x84] ss:$8 sps:$4 sm:$0xff]   ;;  %v3071_v11 = vld [vmem:[#allocation7 + $0x80] ss:$8 sps:$4 sm:$0xff]  }
 0x31f   :  { %v925_v48 = vmul.f32 %v909_v29, %v861_v37  ;;  %2066 = vmatprep.subr.bf16.mxu0 %v3013_v6  ;;  %2139 = vmatprep.subr.bf16.mxu1 %v3016_v8  ;;  %v932_v0 = vpack.c.bf16 %v924_v44, %v922_v17  ;;  %v3076_v45 = vld [vmem:[#allocation7 + $0x184] ss:$8 sps:$4 sm:$0xff]   ;;  %v3074_v39 = vld [vmem:[#allocation7 + $0x180] ss:$8 sps:$4 sm:$0xff]   ;;  %v3079_v53 = vld [vmem:[#allocation9 + $0x74] ss:$8 sps:$4 sm:$0xff]  }
 0x320   :  { %v2590_v12 = vld [vmem:[%s4048_s8 + $0x3] ss:$8 sm:$0xf] }
 0x321   :  { %v933_v9 = vpack.c.bf16 %v925_v48, %v923_v42  ;;  %v3754_v6 = vrot.slane %v2590_v12, %v3544_v23  ;;  %v3757_v24 = vrot.slane %v2590_v12, %v1009_v15  ;;  %v3760_v28 = vrot.slane %v2590_v12, %v3550_v25 }
 0x322   :  { %2067 = vmatpush1.bf16.msra.mxu0 %v3011_v10  ;;  %2140 = vmatpush1.bf16.msra.mxu1 %v3014_v19  ;;  %v3763_v10 = vrot.slane %v2590_v12, %v1013_v18 }
 0x323   :  { %1401 = vmatprep.mubr.bf16.mxu0 %v933_v9  ;;  %1474 = vmatprep.mubr.bf16.mxu1 %v933_v9 }
 0x324   :  { %2068 = vmatprep.subr.bf16.mxu0 %v3019_v47  ;;  %2141 = vmatprep.subr.bf16.mxu1 %v3022_v27 }
 0x325   :  { %1402 = vmatmul.mubr.bf16.gmra.mxu0 %v932_v0  ;;  %1475 = vmatmul.mubr.bf16.gmra.mxu1 %v932_v0 }
 0x326   :  { %2069 = vmatpush1.bf16.msra.mxu0 %v3017_v36  ;;  %2142 = vmatpush1.bf16.msra.mxu1 %v3020_v14 }
 0x327   :  { %2070 = vmatprep.subr.bf16.mxu0 %v3025_v4  ;;  %2143 = vmatprep.subr.bf16.mxu1 %v3028_v61 }
 0x32a   :  { %2071 = vmatpush1.bf16.msra.mxu0 %v3023_v49  ;;  %2144 = vmatpush1.bf16.msra.mxu1 %v3026_v30 }
 0x32b   :  { %2072 = vmatprep.subr.bf16.mxu0 %v3031_v31  ;;  %2145 = vmatprep.subr.bf16.mxu1 %v3034_v34 }
 0x32e   :  { %2073 = vmatpush2.bf16.msra.mxu0 %v3029_v7  ;;  %2146 = vmatpush2.bf16.msra.mxu1 %v3032_v20 }
 0x32f   :  { %2074 = vmatprep.subr.bf16.mxu0 %v3037_v21  ;;  %2147 = vmatprep.subr.bf16.mxu1 %v3040_v32 }
 0x332   :  { %2075 = vmatpush2.bf16.msra.mxu0 %v3035_v40  ;;  %2148 = vmatpush2.bf16.msra.mxu1 %v3038_v43 }
 0x333   :  { %2076 = vmatprep.subr.bf16.mxu0 %v3043_v62  ;;  %2149 = vmatprep.subr.bf16.mxu1 %v3046_v41 }
 0x336   :  { %2077 = vmatpush2.bf16.msra.mxu0 %v3041_v46  ;;  %2150 = vmatpush2.bf16.msra.mxu1 %v3044_v33 }
 0x337   :  { %2078 = vmatprep.subr.bf16.mxu0 %v3049_v26  ;;  %2151 = vmatprep.subr.bf16.mxu1 %v3052_v35 }
 0x33a   :  { %2079 = vmatpush2.bf16.msra.mxu0 %v3047_v51  ;;  %2152 = vmatpush2.bf16.msra.mxu1 %v3050_v52 }
 0x33b   :  { %2080 = vmatprep.subr.bf16.mxu0 %v3055_v54  ;;  %2153 = vmatprep.subr.bf16.mxu1 %v3058_v55 }
 0x33e   :  { %2081 = vmatpush2.bf16.msra.mxu0 %v3053_v50  ;;  %2154 = vmatpush2.bf16.msra.mxu1 %v3056_v56 }
 0x33f   :  { %2082 = vmatprep.subr.bf16.mxu0 %v3061_v58  ;;  %2155 = vmatprep.subr.bf16.mxu1 %v3064_v60 }
 0x342   :  { %2083 = vmatpush2.bf16.msra.mxu0 %v3059_v63  ;;  %2156 = vmatpush2.bf16.msra.mxu1 %v3062_v16 }
 0x343   :  { %2084 = vmatprep.subr.bf16.mxu0 %v3067_v3  ;;  %2157 = vmatprep.subr.bf16.mxu1 %v3070_v59 }
 0x346   :  { %2085 = vmatpush2.bf16.msra.mxu0 %v3065_v1  ;;  %2158 = vmatpush2.bf16.msra.mxu1 %v3068_v2 }
 0x347   :  { %2086 = vmatprep.subr.bf16.mxu0 %v3073_v5  ;;  %2159 = vmatprep.subr.bf16.mxu1 %v3076_v45 }
 0x34a   :  { %2087 = vmatpush2.bf16.msra.mxu0 %v3071_v11  ;;  %2160 = vmatpush2.bf16.msra.mxu1 %v3074_v39 }
 0x34b   :  { %2493 = vmatprep.subr.bf16.mxu0 %v3079_v53 }
 0x3cc   :  { %v1373_v8 = vpop.f32.mrf.mxu0  ;;  %v1446_v57 = vpop.f32.mrf.mxu1 }
 0x3cd   :  { %v1374_v38 = vadd.f32 %v1373_v8, %v3754_v6  ;;  %v1447_v42 = vadd.f32 %v1446_v57, %v3757_v24 }
 0x3ce   :  { %v1375_v37 = vpop.f32.mrf.mxu0  ;;  %v1448_v29 = vpop.f32.mrf.mxu1 }
 0x3cf   :  { %v1376_v48 = vadd.f32 %v1375_v37, %v3760_v28  ;;  %v1517_v27 = vmul.f32 0.70710677, %v1374_v38  ;;  %v1449_v9 = vadd.f32 %v1448_v29, %v3763_v10  ;;  %v1519_v14 = vmul.f32 0.70710677, %v1447_v42 }
 0x3d0   :  { %v1377_v19 = vpop.f32.mrf.mxu0  ;;  %v1450_v13 = vpop.f32.mrf.mxu1  ;;  %v3784_v1 = vmul.f32 0.5, %v1374_v38  ;;  %v3787_v5 = vmul.f32 0.5, %v1447_v42 }
 0x3d1   :  { %v1378_v22 = vadd.f32 %v1377_v19, %v3754_v6  ;;  %v1451_v0 = vadd.f32 %v1450_v13, %v3757_v24  ;;  %v1518_v4 = vmul.f32 0.70710677, %v1376_v48  ;;  %3205 = verf.f32 %v1517_v27 }
 0x3d2   :  { %v1379_v44 = vpop.f32.mrf.mxu0  ;;  %v1452_v47 = vpop.f32.mrf.mxu1  ;;  %v1520_v34 = vmul.f32 0.70710677, %v1449_v9  ;;  %3207 = verf.f32 %v1519_v14  ;;  %v3789_v45 = vmul.f32 0.5, %v1376_v48  ;;  %v3791_v12 = vmul.f32 0.5, %v1449_v9 }
 0x3d3   :  { %v1521_v30 = vmul.f32 0.70710677, %v1378_v22  ;;  %v1380_v31 = vadd.f32 %v1379_v44, %v3760_v28  ;;  %v1453_v7 = vadd.f32 %v1452_v47, %v3763_v10  ;;  %v1523_v32 = vmul.f32 0.70710677, %v1451_v0 }
 0x3d4   :  { %v1383_v17 = vpop.f32.mrf.mxu0  ;;  %v1456_v36 = vpop.f32.mrf.mxu1  ;;  %3209 = verf.f32 %v1518_v4  ;;  %v1489_v57 = vmul.f32 0.5, %v1378_v22  ;;  %v3800_v38 = vmul.f32 0.5, %v1451_v0 }
 0x3d5   :  { %3211 = verf.f32 %v1521_v30  ;;  %v1522_v62 = vmul.f32 0.70710677, %v1380_v31  ;;  %v1524_v46 = vmul.f32 0.70710677, %v1453_v7  ;;  %v1384_v54 = vadd.f32 %v1383_v17, %v3754_v6 }
 0x3d6   :  { %v1385_v61 = vpop.f32.mrf.mxu0  ;;  %v1458_v49 = vpop.f32.mrf.mxu1  ;;  %3213 = verf.f32 %v1520_v34  ;;  %v3780_v56 = vadd.f32 %v1456_v36, %v3757_v24  ;;  %v3802_v19 = vmul.f32 0.5, %v1380_v31  ;;  %v3807_v44 = vmul.f32 0.5, %v1453_v7 }
 0x3d7   :  { %v1386_v41 = vadd.f32 %v1385_v61, %v3760_v28  ;;  %v1459_v33 = vadd.f32 %v1458_v49, %v3763_v10  ;;  %3215 = verf.f32 %v1523_v32  ;;  %v1525_v11 = vmul.f32 0.70710677, %v1384_v54 }
 0x3d8   :  { %v1387_v20 = vpop.f32.mrf.mxu0  ;;  %v1460_v21 = vpop.f32.mrf.mxu1  ;;  %3217 = verf.f32 %v1522_v62  ;;  %v1527_v15 = vmul.f32 0.70710677, %v3780_v56  ;;  %v3809_v47 = vmul.f32 0.5, %v1384_v54 }
 0x3d9   :  { %v1526_v58 = vmul.f32 0.70710677, %v1386_v41  ;;  %3219 = verf.f32 %v1524_v46  ;;  %v1528_v63 = vmul.f32 0.70710677, %v1459_v33  ;;  %v1388_v16 = vadd.f32 %v1387_v20, %v3754_v6 }
 0x3da   :  { %v1389_v40 = vpop.f32.mrf.mxu0  ;;  %v1462_v43 = vpop.f32.mrf.mxu1  ;;  %v1461_v2 = vadd.f32 %v1460_v21, %v3757_v24  ;;  %v3814_v36 = vmul.f32 0.5, %v1386_v41  ;;  %v3816_v14 = vmul.f32 0.5, %v1459_v33 }
 0x3db   :  { %v1390_v51 = vadd.f32 %v1389_v40, %v3760_v28  ;;  %v3776_v52 = vadd.f32 %v1462_v43, %v3763_v10  ;;  %v1529_v18 = vmul.f32 0.70710677, %v1388_v16  ;;  %v3819_v61 = vmul.f32 0.5, %v1388_v16 }
 0x3dc   :  { %v1531_v13 = vmul.f32 0.70710677, %v1461_v2  ;;  %v3821_v49 = vmul.f32 0.5, %v1461_v2 }
 0x3dd   :  { %v1393_v26 = vpop.f32.mrf.mxu0  ;;  %v1466_v35 = vpop.f32.mrf.mxu1  ;;  %v1530_v60 = vmul.f32 0.70710677, %v1390_v51  ;;  %v1532_v3 = vmul.f32 0.70710677, %v3776_v52  ;;  %v3828_v32 = vmul.f32 0.5, %v1390_v51 }
 0x3de   :  { %v3206_v29 = vpop.eup %3205  ;;  %v3805_v42 = vadd.f32 %v1393_v26, %v3754_v6  ;;  %v3812_v22 = vadd.f32 %v1466_v35, %v3757_v24 }
 0x3df   :  { %v1395_v55 = vpop.f32.mrf.mxu0  ;;  %v1468_v50 = vpop.f32.mrf.mxu1  ;;  %3221 = verf.f32 %v1530_v60  ;;  %v1581_v34 = vadd.f32 1.0, %v3206_v29 }
 0x3e0   :  { %3223 = verf.f32 %v1532_v3  ;;  %v3795_v8 = vadd.f32 %v1395_v55, %v3760_v28  ;;  %v3798_v37 = vadd.f32 %v1468_v50, %v3763_v10  ;;  %v3208_v48 = vpop.eup %3207  ;;  %v1533_v7 = vmul.f32 0.70710677, %v3805_v42 }
 0x3e1   :  { %v1397_v59 = vpop.f32.mrf.mxu0  ;;  %v1470_v39 = vpop.f32.mrf.mxu1  ;;  %3225 = verf.f32 %v1526_v58  ;;  %v1535_v40 = vmul.f32 0.70710677, %v3812_v22  ;;  %v1583_v33 = vadd.f32 1.0, %v3208_v48  ;;  %v1500_v50 = vmul.f32 0.5, %v3776_v52 }
 0x3e2   :  { %3227 = verf.f32 %v1528_v63  ;;  %v3210_v17 = vpop.eup %3209  ;;  %v1534_v0 = vmul.f32 0.70710677, %v3795_v8  ;;  %v1536_v30 = vmul.f32 0.70710677, %v3798_v37  ;;  %v3826_v20 = vadd.f32 %v1397_v59, %v3754_v6 }
 0x3e3   :  { %v1399_v53 = vpop.f32.mrf.mxu0  ;;  %3229 = verf.f32 %v1525_v11  ;;  %v1472_v27 = vpop.f32.mrf.mxu1  ;;  %v3832_v43 = vadd.f32 %v1470_v39, %v3757_v24  ;;  %v1582_v55 = vadd.f32 1.0, %v3210_v17  ;;  %v3844_v59 = vmul.f32 %v1581_v34, %v3784_v1 }
 0x3e4   :  { %3231 = verf.f32 %v1527_v15  ;;  %v3212_v4 = vpop.eup %3211  ;;  %v3835_v62 = vadd.f32 %v1399_v53, %v3760_v28  ;;  %v3838_v35 = vadd.f32 %v1472_v27, %v3763_v10  ;;  %v1537_v63 = vmul.f32 0.70710677, %v3826_v20 }
 0x3e5   :  { %v1403_v9 = vpop.f32.mrf.mxu0  ;;  %3233 = verf.f32 %v1529_v18  ;;  %v3214_v31 = vpop.eup %3213  ;;  %v1585_v26 = vadd.f32 1.0, %v3212_v4  ;;  %v1539_v2 = vmul.f32 0.70710677, %v3832_v43  ;;  %v3854_v48 = vmul.f32 %v1583_v33, %v3787_v5 }
 0x3e6   :  { %3235 = verf.f32 %v1531_v13  ;;  %v3216_v21 = vpop.eup %3215  ;;  %v1476_v41 = vpop.f32.mrf.mxu1  ;;  %v1584_v51 = vadd.f32 1.0, %v3214_v31  ;;  %v1538_v16 = vmul.f32 0.70710677, %v3835_v62  ;;  %v1540_v11 = vmul.f32 0.70710677, %v3838_v35 }
 0x3e7   :  { %v1405_v46 = vpop.f32.mrf.mxu0  ;;  %3237 = verf.f32 %v1534_v0  ;;  %v3218_v54 = vpop.eup %3217  ;;  %v1587_v60 = vadd.f32 1.0, %v3216_v21  ;;  %v3848_v15 = vmul.f32 %v1585_v26, %v1489_v57  ;;  %v3851_v29 = vadd.f32 %v1403_v9, %v3754_v6 }
 0x3e8   :  { %3239 = verf.f32 %v1536_v30  ;;  %v3220_v58 = vpop.eup %3219  ;;  %v1478_v39 = vpop.f32.mrf.mxu1  ;;  %v1586_v18 = vadd.f32 1.0, %v3218_v54  ;;  %v1614_v1 = vmul.f32 %v1582_v55, %v3789_v45  ;;  %v3858_v27 = vadd.f32 %v1405_v46, %v3760_v28 }
 0x3e9   :  { %3241 = verf.f32 %v1533_v7  ;;  %v1407_v53 = vpop.f32.mrf.mxu0  ;;  %v3861_v0 = vmul.f32 %v1584_v51, %v3791_v12  ;;  %v3864_v57 = vmul.f32 %v1587_v60, %v3800_v38  ;;  %v1588_v4 = vadd.f32 1.0, %v3220_v58 }
 0x3ea   :  { %3243 = verf.f32 %v1535_v40  ;;  %v1541_v5 = vmul.f32 0.70710677, %v3851_v29  ;;  %v1480_v31 = vpop.f32.mrf.mxu1  ;;  %v1645_v7 = vpack.c.bf16 %v3848_v15, %v3844_v59  ;;  %v1618_v21 = vmul.f32 %v1586_v18, %v3802_v19 }
 0x3eb   :  { %3245 = verf.f32 %v1538_v16  ;;  %v1409_v45 = vpop.f32.mrf.mxu0  ;;  %v1542_v40 = vmul.f32 0.70710677, %v3858_v27  ;;  %v3872_v33 = vadd.f32 %v1476_v41, %v3757_v24  ;;  %v3875_v26 = vadd.f32 %v1478_v39, %v3763_v10 }
 0x3ec   :  { %v3222_v3 = vpop.eup %3221  ;;  %3247 = verf.f32 %v1540_v11  ;;  %v3878_v54 = vadd.f32 %v1407_v53, %v3754_v6  ;;  %v1647_v51 = vpack.c.bf16 %v3864_v57, %v3854_v48  ;;  %v1620_v19 = vmul.f32 %v1588_v4, %v3807_v44  ;;  %v3077_v48 = vld [vmem:[#allocation9 + $0x70] ss:$8 sps:$4 sm:$0xff]  }
 0x3ed   :  { %v3224_v52 = vpop.eup %3223  ;;  %3249 = verf.f32 %v1537_v63  ;;  %v1594_v9 = vadd.f32 1.0, %v3222_v3  ;;  %v3884_v58 = vadd.f32 %v1480_v31, %v3757_v24  ;;  %v3887_v60 = vadd.f32 %v1409_v45, %v3760_v28  ;;  %v1482_v3 = vpop.f32.mrf.mxu1 }
 0x3ee   :  { %v3226_v13 = vpop.eup %3225  ;;  %v1596_v30 = vadd.f32 1.0, %v3224_v52  ;;  %3251 = verf.f32 %v1539_v2  ;;  %v1544_v6 = vmul.f32 0.70710677, %v3875_v26  ;;  %v1545_v2 = vmul.f32 0.70710677, %v3878_v54 }
 0x3ef   :  { %v3228_v17 = vpop.eup %3227  ;;  %v1590_v12 = vadd.f32 1.0, %v3226_v13  ;;  %v1626_v63 = vmul.f32 %v1594_v9, %v3828_v32  ;;  %3253 = verf.f32 %v1541_v5  ;;  %v1547_v44 = vmul.f32 0.70710677, %v3884_v58  ;;  %v3082_v9 = vld [vmem:[#allocation9 + $0x64] ss:$8 sps:$4 sm:$0xff]  }
 0x3f0   :  { %v3230_v34 = vpop.eup %3229  ;;  %v1592_v46 = vadd.f32 1.0, %v3228_v17  ;;  %v1628_v16 = vmul.f32 %v1596_v30, %v1500_v50  ;;  %3255 = verf.f32 %v1542_v40  ;;  %v1543_v28 = vmul.f32 0.70710677, %v3872_v33 }
 0x3f1   :  { %v3232_v38 = vpop.eup %3231  ;;  %v1622_v59 = vmul.f32 %v1590_v12, %v3814_v36  ;;  %3257 = verf.f32 %v1544_v6  ;;  %v1546_v32 = vmul.f32 0.70710677, %v3887_v60  ;;  %v3898_v53 = vadd.f32 %v1482_v3, %v3763_v10 }
 0x3f2   :  { %v3234_v55 = vpop.eup %3233  ;;  %v1624_v11 = vmul.f32 %v1592_v46, %v3816_v14  ;;  %3259 = verf.f32 %v1545_v2  ;;  %v1646_v36 = vpack.c.bf16 %v1618_v21, %v1614_v1  ;;  %v1648_v15 = vpack.c.bf16 %v1620_v19, %v3861_v0 }
 0x3f3   :  { %v3236_v41 = vpop.eup %3235  ;;  %v1593_v39 = vadd.f32 1.0, %v3234_v55  ;;  %3261 = verf.f32 %v1547_v44  ;;  %v1650_v18 = vpack.c.bf16 %v1626_v63, %v1622_v59  ;;  %v1548_v4 = vmul.f32 0.70710677, %v3898_v53  ;;  %v3080_v55 = vld [vmem:[#allocation9 + $0x60] ss:$8 sps:$4 sm:$0xff]  }
 0x3f4   :  { %v3238_v24 = vpop.eup %3237  ;;  %v1652_v13 = vpack.c.bf16 %v1628_v16, %v1624_v11  ;;  %v1595_v17 = vadd.f32 1.0, %v3236_v41  ;;  %3263 = verf.f32 %v1546_v32  ;;  %2088 = vmatprep.mubr.bf16.mxu0 %v1646_v36  ;;  %v1589_v5 = vadd.f32 1.0, %v3230_v34  ;;  %2161 = vmatprep.mubr.bf16.mxu1 %v1648_v15  ;;  %v3083_v44 = vld [vmem:[#allocation9 + $0x50] ss:$8 sps:$4 sm:$0xff]  }
 0x3f5   :  { %v3240_v50 = vpop.eup %3239  ;;  %v1598_v57 = vadd.f32 1.0, %v3238_v24  ;;  %v1502_v10 = vmul.f32 0.5, %v3795_v8  ;;  %3265 = verf.f32 %v1543_v28  ;;  %2089 = vmatmul.mubr.bf16.vlgmr.msra.gmra.mxu0 %v1645_v7  ;;  %v1591_v31 = vadd.f32 1.0, %v3232_v38  ;;  %2162 = vmatmul.mubr.bf16.vlgmr.msra.gmra.mxu1 %v1647_v51  ;;  %v3085_v51 = vld [vmem:[#allocation9 + $0x54] ss:$8 sps:$4 sm:$0xff]  }
 0x3f6   :  { %v3242_v52 = vpop.eup %3241  ;;  %v1600_v1 = vadd.f32 1.0, %v3240_v50  ;;  %v1506_v45 = vmul.f32 0.5, %v3835_v62  ;;  %3267 = verf.f32 %v1548_v4  ;;  %2098 = vmatprep.mubr.bf16.mxu0 %v1650_v18  ;;  %v1625_v40 = vmul.f32 %v1593_v39, %v3819_v61  ;;  %2171 = vmatprep.mubr.bf16.mxu1 %v1652_v13 }
 0x3f7   :  { %v3244_v14 = vpop.eup %3243  ;;  %v1504_v46 = vmul.f32 0.5, %v3798_v37  ;;  %v1508_v34 = vmul.f32 0.5, %v3838_v35  ;;  %2494 = vmatpush1.bf16.msra.mxu0 %v3077_v48  ;;  %v1495_v38 = vmul.f32 0.5, %v3780_v56  ;;  %v1627_v62 = vmul.f32 %v1595_v17, %v3821_v49  ;;  %v3088_v49 = vld [vmem:[#allocation9 + $0x44] ss:$8 sps:$4 sm:$0xff]  }
 0x3f8   :  { %v3246_v30 = vpop.eup %3245  ;;  %v1630_v19 = vmul.f32 %v1598_v57, %v1502_v10  ;;  %2495 = vmatprep.subr.bf16.mxu0 %v3082_v9  ;;  %v1621_v63 = vmul.f32 %v1589_v5, %v3809_v47  ;;  %v1597_v28 = vadd.f32 1.0, %v3242_v52  ;;  %v1599_v32 = vadd.f32 1.0, %v3244_v14  ;;  %v3086_v17 = vld [vmem:[#allocation9 + $0x40] ss:$8 sps:$4 sm:$0xff]  }
 0x3f9   :  { %v3248_v0 = vpop.eup %3247  ;;  %v1602_v21 = vadd.f32 1.0, %v3246_v30  ;;  %v1632_v61 = vmul.f32 %v1600_v1, %v1504_v46  ;;  %v1623_v37 = vmul.f32 %v1591_v31, %v1495_v38  ;;  %v1505_v50 = vmul.f32 0.5, %v3826_v20  ;;  %v3091_v20 = vld [vmem:[#allocation9 + $0x34] ss:$8 sps:$4 sm:$0xff]  }
 0x3fa   :  { %v3250_v12 = vpop.eup %3249  ;;  %v1604_v8 = vadd.f32 1.0, %v3248_v0  ;;  %v1649_v59 = vpack.c.bf16 %v1625_v40, %v1621_v63  ;;  %v1507_v47 = vmul.f32 0.5, %v3832_v43  ;;  %v1501_v15 = vmul.f32 0.5, %v3805_v42 }
 0x3fb   :  { %v3252_v7 = vpop.eup %3251  ;;  %v1634_v41 = vmul.f32 %v1602_v21, %v1506_v45  ;;  %v1601_v35 = vadd.f32 1.0, %v3250_v12  ;;  %2496 = vmatpush1.bf16.msra.mxu0 %v3080_v55  ;;  %v1651_v56 = vpack.c.bf16 %v1627_v62, %v1623_v37  ;;  %v1503_v18 = vmul.f32 0.5, %v3812_v22  ;;  %v3089_v12 = vld [vmem:[#allocation9 + $0x30] ss:$8 sps:$4 sm:$0xff]  }
 0x3fc   :  { %v1636_v16 = vmul.f32 %v1604_v8, %v1508_v34  ;;  %v1603_v3 = vadd.f32 1.0, %v3252_v7  ;;  %v3254_v24 = vpop.eup %3253  ;;  %2497 = vmatprep.subr.bf16.mxu0 %v3085_v51  ;;  %v1629_v43 = vmul.f32 %v1597_v28, %v1501_v15  ;;  %v1510_v9 = vmul.f32 0.5, %v3858_v27  ;;  %v3094_v27 = vld [vmem:[#allocation9 + $0x24] ss:$8 sps:$4 sm:$0xff]   ;;  %v3092_v51 = vld [vmem:[#allocation9 + $0x20] ss:$8 sps:$4 sm:$0xff]  }
 0x3fd   :  { %v1654_v6 = vpack.c.bf16 %v1634_v41, %v1630_v19  ;;  %v3256_v11 = vpop.eup %3255  ;;  %2099 = vmatmul.mubr.bf16.gmra.mxu0 %v1649_v59  ;;  %2172 = vmatmul.mubr.bf16.gmra.mxu1 %v1651_v56  ;;  %v1633_v13 = vmul.f32 %v1601_v35, %v1505_v50  ;;  %v1631_v4 = vmul.f32 %v1599_v32, %v1503_v18  ;;  %v1512_v5 = vmul.f32 0.5, %v3875_v26  ;;  %v3095_v35 = vld [vmem:[#allocation9 + $0x10] ss:$8 sps:$4 sm:$0xff]   ;;  %v3100_v59 = vld [vmem:[#allocation9 + $0x4] ss:$8 sps:$4 sm:$0xff]  }
 0x3fe   :  { %v1656_v2 = vpack.c.bf16 %v1636_v16, %v1632_v61  ;;  %v3258_v39 = vpop.eup %3257  ;;  %v1635_v48 = vmul.f32 %v1603_v3, %v1507_v47  ;;  %v1606_v14 = vadd.f32 1.0, %v3256_v11  ;;  %v1514_v22 = vmul.f32 0.5, %v3887_v60  ;;  %v3109_v56 = vld [vmem:[#allocation9 + $0xd4] ss:$8 sps:$4 sm:$0xff]   ;;  %v3112_v11 = vld [vmem:[#allocation9 + $0xc4] ss:$8 sps:$4 sm:$0xff]  }
 0x3ff   :  { %2108 = vmatprep.mubr.bf16.mxu0 %v1654_v6  ;;  %v3260_v36 = vpop.eup %3259  ;;  %2498 = vmatpush1.bf16.msra.mxu0 %v3083_v44  ;;  %v1608_v42 = vadd.f32 1.0, %v3258_v39  ;;  %v1516_v31 = vmul.f32 0.5, %v3898_v53  ;;  %v1653_v45 = vpack.c.bf16 %v1633_v13, %v1629_v43  ;;  %v1605_v55 = vadd.f32 1.0, %v3254_v24  ;;  %v3106_v44 = vld [vmem:[#allocation9 + $0xe4] ss:$8 sps:$4 sm:$0xff]  }
 0x400   :  { %2181 = vmatprep.mubr.bf16.mxu1 %v1656_v2  ;;  %v3262_v52 = vpop.eup %3261  ;;  %2499 = vmatprep.subr.bf16.mxu0 %v3088_v49  ;;  %v1609_v0 = vadd.f32 1.0, %v3260_v36  ;;  %v1655_v21 = vpack.c.bf16 %v1635_v48, %v1631_v4  ;;  %v1638_v40 = vmul.f32 %v1606_v14, %v1510_v9  ;;  %v1513_v26 = vmul.f32 0.5, %v3878_v54  ;;  %v3097_v54 = vld [vmem:[#allocation9 + $0x14] ss:$8 sps:$4 sm:$0xff]   ;;  %v3101_v2 = vld [vmem:[#allocation9 + $0xf0] ss:$8 sps:$4 sm:$0xff]  }
 0x401   :  { %v3264_v57 = vpop.eup %3263  ;;  %v1611_v46 = vadd.f32 1.0, %v3262_v52  ;;  %v1515_v60 = vmul.f32 0.5, %v3884_v58  ;;  %v1640_v38 = vmul.f32 %v1608_v42, %v1512_v5  ;;  %v1509_v19 = vmul.f32 0.5, %v3851_v29  ;;  %v3098_v29 = vld [vmem:[#allocation9] ss:$8 sps:$4 sm:$0xff]  }
 0x402   :  { %v3266_v30 = vpop.eup %3265  ;;  %v1610_v10 = vadd.f32 1.0, %v3264_v57  ;;  %v1641_v41 = vmul.f32 %v1609_v0, %v1513_v26  ;;  %v1511_v63 = vmul.f32 0.5, %v3872_v33  ;;  %v3103_v33 = vld [vmem:[#allocation9 + $0xf4] ss:$8 sps:$4 sm:$0xff]   ;;  %v3104_v24 = vld [vmem:[#allocation9 + $0xe0] ss:$8 sps:$4 sm:$0xff]  }
 0x403   :  { %v3268_v1 = vpop.eup %3267  ;;  %2500 = vmatpush1.bf16.msra.mxu0 %v3086_v17  ;;  %v1607_v7 = vadd.f32 1.0, %v3266_v30  ;;  %v1643_v61 = vmul.f32 %v1611_v46, %v1515_v60  ;;  %v1637_v37 = vmul.f32 %v1605_v55, %v1509_v19  ;;  %v3107_v49 = vld [vmem:[#allocation9 + $0xd0] ss:$8 sps:$4 sm:$0xff]   ;;  %v3110_v28 = vld [vmem:[#allocation9 + $0xc0] ss:$8 sps:$4 sm:$0xff]  }
 0x404   :  { %v1642_v34 = vmul.f32 %v1610_v10, %v1514_v22  ;;  %v1612_v8 = vadd.f32 1.0, %v3268_v1  ;;  %2501 = vmatprep.subr.bf16.mxu0 %v3091_v20  ;;  %v3115_v32 = vld [vmem:[#allocation9 + $0xb4] ss:$8 sps:$4 sm:$0xff]   ;;  %v3113_v50 = vld [vmem:[#allocation9 + $0xb0] ss:$8 sps:$4 sm:$0xff]  }
 0x405   :  { %2109 = vmatmul.mubr.bf16.gmra.mxu0 %v1653_v45  ;;  %2182 = vmatmul.mubr.bf16.gmra.mxu1 %v1655_v21  ;;  %v1639_v58 = vmul.f32 %v1607_v7, %v1511_v63  ;;  %v1657_v6 = vpack.c.bf16 %v1641_v41, %v1637_v37  ;;  %v3118_v47 = vld [vmem:[#allocation9 + $0xa4] ss:$8 sps:$4 sm:$0xff]   ;;  %v3116_v39 = vld [vmem:[#allocation9 + $0xa0] ss:$8 sps:$4 sm:$0xff]   ;;  %v3121_v36 = vld [vmem:[#allocation9 + $0x94] ss:$8 sps:$4 sm:$0xff]  }
 0x406   :  { %v1644_v62 = vmul.f32 %v1612_v8, %v1516_v31  ;;  %v1658_v53 = vpack.c.bf16 %v1642_v34, %v1638_v40  ;;  %v3119_v15 = vld [vmem:[#allocation9 + $0x90] ss:$8 sps:$4 sm:$0xff]   ;;  %v3124_v18 = vld [vmem:[#allocation9 + $0x84] ss:$8 sps:$4 sm:$0xff]   ;;  %v3122_v13 = vld [vmem:[#allocation9 + $0x80] ss:$8 sps:$4 sm:$0xff]  }
 0x407   :  { %2502 = vmatpush1.bf16.msra.mxu0 %v3089_v12  ;;  %v1659_v3 = vpack.c.bf16 %v1643_v61, %v1639_v58  ;;  %v2591_v48 = vld [vmem:[%s4048_s8 + $0x4] ss:$8 sm:$0x3] }
 0x408   :  { %2118 = vmatprep.mubr.bf16.mxu0 %v1658_v53  ;;  %v1660_v16 = vpack.c.bf16 %v1644_v62, %v1640_v38  ;;  %2503 = vmatprep.subr.bf16.mxu0 %v3094_v27  ;;  %v3926_v17 = vrot.slane %v2591_v48, %v3544_v23  ;;  %v3929_v52 = vrot.slane %v2591_v48, %v3550_v25 }
 0x40a   :  { %2191 = vmatprep.mubr.bf16.mxu1 %v1660_v16 }
 0x40b   :  { %2504 = vmatpush1.bf16.msra.mxu0 %v3092_v51 }
 0x40c   :  { %2505 = vmatprep.subr.bf16.mxu0 %v3097_v54 }
 0x40d   :  { %2119 = vmatmul.mubr.bf16.gmra.mxu0 %v1657_v6  ;;  %2192 = vmatmul.mubr.bf16.gmra.mxu1 %v1659_v3 }
 0x40f   :  { %2506 = vmatpush1.bf16.msra.mxu0 %v3095_v35 }
 0x410   :  { %2507 = vmatprep.subr.bf16.mxu0 %v3100_v59 }
 0x413   :  { %2508 = vmatpush1.bf16.msra.mxu0 %v3098_v29 }
 0x414   :  { %2509 = vmatprep.subr.bf16.mxu0 %v3103_v33 }
 0x417   :  { %2510 = vmatpush2.bf16.msra.mxu0 %v3101_v2 }
 0x418   :  { %2511 = vmatprep.subr.bf16.mxu0 %v3106_v44 }
 0x41b   :  { %2512 = vmatpush2.bf16.msra.mxu0 %v3104_v24 }
 0x41c   :  { %2513 = vmatprep.subr.bf16.mxu0 %v3109_v56 }
 0x41f   :  { %2514 = vmatpush2.bf16.msra.mxu0 %v3107_v49 }
 0x420   :  { %2515 = vmatprep.subr.bf16.mxu0 %v3112_v11 }
 0x423   :  { %2516 = vmatpush2.bf16.msra.mxu0 %v3110_v28 }
 0x424   :  { %2517 = vmatprep.subr.bf16.mxu0 %v3115_v32 }
 0x427   :  { %2518 = vmatpush2.bf16.msra.mxu0 %v3113_v50 }
 0x428   :  { %2519 = vmatprep.subr.bf16.mxu0 %v3118_v47 }
 0x42b   :  { %2520 = vmatpush2.bf16.msra.mxu0 %v3116_v39 }
 0x42c   :  { %2521 = vmatprep.subr.bf16.mxu0 %v3121_v36 }
 0x42f   :  { %2522 = vmatpush2.bf16.msra.mxu0 %v3119_v15 }
 0x430   :  { %2523 = vmatprep.subr.bf16.mxu0 %v3124_v18 }
 0x433   :  { %2524 = vmatpush2.bf16.msra.mxu0 %v3122_v13 }
 0x4b5   :  { %v2090_v14 = vpop.f32.mrf.mxu0  ;;  %v2163_v57 = vpop.f32.mrf.mxu1 }
 0x4b6   :  { %v2091_v20 = vadd.f32 %v2090_v14, %v3926_v17 }
 0x4b7   :  { %v2092_v43 = vpop.f32.mrf.mxu0  ;;  %v2165_v30 = vpop.f32.mrf.mxu1 }
 0x4b8   :  { %v3932_v4 = vadd.f32 %v2163_v57, %v2091_v20  ;;  %v2093_v9 = vadd.f32 %v2092_v43, %v3929_v52 }
 0x4b9   :  { %v2094_v5 = vpop.f32.mrf.mxu0  ;;  %v2167_v10 = vpop.f32.mrf.mxu1 }
 0x4ba   :  { %v2166_v42 = vadd.f32 %v2165_v30, %v2093_v9  ;;  %v2095_v22 = vadd.f32 %v2094_v5, %v3926_v17  ;;  %v2218_v1 = vmul.f32 0.70710677, %v3932_v4 }
 0x4bb   :  { %v2096_v0 = vpop.f32.mrf.mxu0  ;;  %v2169_v21 = vpop.f32.mrf.mxu1 }
 0x4bc   :  { %v2219_v31 = vmul.f32 0.70710677, %v2166_v42  ;;  %v2168_v45 = vadd.f32 %v2167_v10, %v2095_v22  ;;  %v2097_v12 = vadd.f32 %v2096_v0, %v3929_v52  ;;  %v2203_v20 = vmul.f32 0.5, %v2166_v42 }
 0x4bd   :  { %v2100_v40 = vpop.f32.mrf.mxu0  ;;  %v2173_v8 = vpop.f32.mrf.mxu1 }
 0x4be   :  { %3269 = verf.f32 %v2219_v31  ;;  %v2220_v46 = vmul.f32 0.70710677, %v2168_v45  ;;  %v2101_v34 = vadd.f32 %v2100_v40, %v3926_v17  ;;  %v2170_v27 = vadd.f32 %v2169_v21, %v2097_v12 }
 0x4bf   :  { %3271 = verf.f32 %v2218_v1  ;;  %v2102_v55 = vpop.f32.mrf.mxu0  ;;  %v2175_v7 = vpop.f32.mrf.mxu1  ;;  %v2204_v5 = vmul.f32 0.5, %v2168_v45 }
 0x4c0   :  { %3273 = verf.f32 %v2220_v46  ;;  %v3939_v26 = vadd.f32 %v2173_v8, %v2101_v34  ;;  %v2103_v60 = vadd.f32 %v2102_v55, %v3929_v52  ;;  %v2221_v38 = vmul.f32 0.70710677, %v2170_v27 }
 0x4c1   :  { %v2104_v62 = vpop.f32.mrf.mxu0  ;;  %v2177_v51 = vpop.f32.mrf.mxu1  ;;  %v2205_v40 = vmul.f32 0.5, %v2170_v27  ;;  %v2202_v8 = vmul.f32 0.5, %v3932_v4 }
 0x4c2   :  { %v2222_v53 = vmul.f32 0.70710677, %v3939_v26  ;;  %v3943_v19 = vadd.f32 %v2175_v7, %v2103_v60  ;;  %v2105_v41 = vadd.f32 %v2104_v62, %v3926_v17  ;;  %3275 = verf.f32 %v2221_v38 }
 0x4c3   :  { %v2106_v63 = vpop.f32.mrf.mxu0  ;;  %v2179_v54 = vpop.f32.mrf.mxu1 }
 0x4c4   :  { %v2223_v61 = vmul.f32 0.70710677, %v3943_v19  ;;  %v3947_v16 = vadd.f32 %v2177_v51, %v2105_v41  ;;  %v2107_v37 = vadd.f32 %v2106_v63, %v3929_v52  ;;  %3277 = verf.f32 %v2222_v53 }
 0x4c5   :  { %v2110_v58 = vpop.f32.mrf.mxu0  ;;  %v2183_v3 = vpop.f32.mrf.mxu1 }
 0x4c6   :  { %v2224_v6 = vmul.f32 0.70710677, %v3947_v16  ;;  %v2111_v35 = vadd.f32 %v2110_v58, %v3926_v17  ;;  %3279 = verf.f32 %v2223_v61  ;;  %v3952_v59 = vadd.f32 %v2179_v54, %v2107_v37 }
 0x4c7   :  { %v2112_v29 = vpop.f32.mrf.mxu0  ;;  %v2185_v44 = vpop.f32.mrf.mxu1 }
 0x4c8   :  { %3281 = verf.f32 %v2224_v6  ;;  %v3954_v33 = vadd.f32 %v2183_v3, %v2111_v35  ;;  %v2113_v2 = vadd.f32 %v2112_v29, %v3929_v52  ;;  %v2225_v24 = vmul.f32 0.70710677, %v3952_v59 }
 0x4c9   :  { %v2114_v56 = vpop.f32.mrf.mxu0  ;;  %v2187_v11 = vpop.f32.mrf.mxu1 }
 0x4ca   :  { %v3958_v49 = vadd.f32 %v2185_v44, %v2113_v2  ;;  %3283 = verf.f32 %v2225_v24  ;;  %v2115_v32 = vadd.f32 %v2114_v56, %v3926_v17  ;;  %v2226_v39 = vmul.f32 0.70710677, %v3954_v33 }
 0x4cb   :  { %v3270_v28 = vpop.eup %3269  ;;  %v2116_v50 = vpop.f32.mrf.mxu0 }
 0x4cc   :  { %v3272_v47 = vpop.eup %3271  ;;  %v2189_v36 = vpop.f32.mrf.mxu1  ;;  %v2227_v18 = vmul.f32 0.70710677, %v3958_v49  ;;  %v3963_v13 = vadd.f32 %v2187_v11, %v2115_v32  ;;  %v2117_v48 = vadd.f32 %v2116_v50, %v3929_v52  ;;  %v2251_v57 = vadd.f32 1.0, %v3270_v28 }
 0x4cd   :  { %v3274_v15 = vpop.eup %3273  ;;  %v2120_v14 = vpop.f32.mrf.mxu0  ;;  %v2250_v31 = vadd.f32 1.0, %v3272_v47  ;;  %v2208_v11 = vmul.f32 0.5, %v3947_v16  ;;  %v2209_v32 = vmul.f32 0.5, %v3952_v59  ;;  %v2206_v47 = vmul.f32 0.5, %v3939_v26 }
 0x4ce   :  { %v2252_v43 = vadd.f32 1.0, %v3274_v15  ;;  %v2121_v9 = vadd.f32 %v2120_v14, %v3926_v17  ;;  %v2193_v30 = vpop.f32.mrf.mxu1  ;;  %3285 = verf.f32 %v2227_v18  ;;  %v2228_v22 = vmul.f32 0.70710677, %v3963_v13 }
 0x4cf   :  { %v3968_v10 = vadd.f32 %v2189_v36, %v2117_v48  ;;  %v2122_v1 = vpop.f32.mrf.mxu0  ;;  %v3276_v0 = vpop.eup %3275  ;;  %3287 = verf.f32 %v2226_v39  ;;  %v2267_v55 = vmul.f32 %v2251_v57, %v2203_v20  ;;  %v2266_v61 = vmul.f32 %v2250_v31, %v2202_v8 }
 0x4d0   :  { %v3970_v21 = vadd.f32 %v2193_v30, %v2121_v9  ;;  %v2123_v12 = vadd.f32 %v2122_v1, %v3929_v52  ;;  %v2195_v42 = vpop.f32.mrf.mxu1  ;;  %v2253_v46 = vadd.f32 1.0, %v3276_v0  ;;  %3289 = verf.f32 %v2228_v22 }
 0x4d1   :  { %v2229_v34 = vmul.f32 0.70710677, %v3968_v10  ;;  %v2124_v45 = vpop.f32.mrf.mxu0  ;;  %v2268_v60 = vmul.f32 %v2252_v43, %v2204_v5  ;;  %v3278_v38 = vpop.eup %3277  ;;  %v2212_v59 = vmul.f32 0.5, %v3963_v13  ;;  %v2211_v26 = vmul.f32 0.5, %v3958_v49 }
 0x4d2   :  { %v2197_v7 = vpop.f32.mrf.mxu1  ;;  %v2269_v62 = vmul.f32 %v2253_v46, %v2205_v40  ;;  %v2196_v53 = vadd.f32 %v2195_v42, %v2123_v12  ;;  %v2125_v41 = vadd.f32 %v2124_v45, %v3926_v17  ;;  %v2230_v27 = vmul.f32 0.70710677, %v3970_v21 }
 0x4d3   :  { %3291 = verf.f32 %v2229_v34  ;;  %v2126_v51 = vpop.f32.mrf.mxu0  ;;  %v3280_v63 = vpop.eup %3279  ;;  %v2282_v3 = vpack.c.bf16 %v2268_v60, %v2266_v61  ;;  %v2254_v56 = vadd.f32 1.0, %v3278_v38  ;;  %v2213_v5 = vmul.f32 0.5, %v3968_v10 }
 0x4d4   :  { %v2127_v54 = vadd.f32 %v2126_v51, %v3929_v52  ;;  %v2231_v58 = vmul.f32 0.70710677, %v2196_v53  ;;  %v2198_v6 = vadd.f32 %v2197_v7, %v2125_v41  ;;  %v2199_v4 = vpop.f32.mrf.mxu1  ;;  %v2283_v35 = vpack.c.bf16 %v2269_v62, %v2267_v55 }
 0x4d5   :  { %v3282_v37 = vpop.eup %3281  ;;  %v2255_v44 = vadd.f32 1.0, %v3280_v63  ;;  %v2207_v52 = vmul.f32 0.5, %v3943_v19  ;;  %v2270_v48 = vmul.f32 %v2254_v56, %v2206_v47  ;;  %v2210_v1 = vmul.f32 0.5, %v3954_v33 }
 0x4d6   :  { %v2256_v29 = vadd.f32 1.0, %v3282_v37  ;;  %v2200_v2 = vadd.f32 %v2199_v4, %v2127_v54  ;;  %3293 = verf.f32 %v2231_v58  ;;  %v2232_v24 = vmul.f32 0.70710677, %v2198_v6  ;;  %2525 = vmatprep.mubr.bf16.mxu0 %v2283_v35 }
 0x4d7   :  { %v3284_v17 = vpop.eup %3283  ;;  %3295 = verf.f32 %v2230_v27  ;;  %2526 = vmatmul.mubr.bf16.vlgmr.msra.gmra.mxu0 %v2282_v3  ;;  %v2271_v36 = vmul.f32 %v2255_v44, %v2207_v52  ;;  %v2215_v13 = vmul.f32 0.5, %v2196_v53  ;;  %v2216_v38 = vmul.f32 0.5, %v2198_v6  ;;  %v2592_v53 = vld [vmem:[%s4048_s8 + $0x5] ss:$8 sm:$0x3] }
 0x4d8   :  { %v2233_v28 = vmul.f32 0.70710677, %v2200_v2  ;;  %v2257_v50 = vadd.f32 1.0, %v3284_v17  ;;  %3297 = verf.f32 %v2232_v24  ;;  %v2272_v39 = vmul.f32 %v2256_v29, %v2208_v11 }
 0x4d9   :  { %v2217_v10 = vmul.f32 0.5, %v2200_v2  ;;  %v2214_v33 = vmul.f32 0.5, %v3970_v21  ;;  %v2326_v37 = vrot.slane %v2592_v53, %v3544_v23  ;;  %v2330_v58 = vrot.slane %v2592_v53, %v3550_v25 }
 0x4da   :  { %3299 = verf.f32 %v2233_v28  ;;  %v2273_v15 = vmul.f32 %v2257_v50, %v2209_v32  ;;  %v2284_v57 = vpack.c.bf16 %v2272_v39, %v2270_v48 }
 0x4db   :  { %v3286_v18 = vpop.eup %3285 }
 0x4dc   :  { %v3288_v14 = vpop.eup %3287  ;;  %v2285_v20 = vpack.c.bf16 %v2273_v15, %v2271_v36  ;;  %v2259_v43 = vadd.f32 1.0, %v3286_v18 }
 0x4dd   :  { %v3290_v16 = vpop.eup %3289  ;;  %v2258_v30 = vadd.f32 1.0, %v3288_v14 }
 0x4de   :  { %v2260_v9 = vadd.f32 1.0, %v3290_v16  ;;  %2535 = vmatprep.mubr.bf16.mxu0 %v2285_v20  ;;  %v2275_v31 = vmul.f32 %v2259_v43, %v2211_v26 }
 0x4df   :  { %2536 = vmatmul.mubr.bf16.gmra.mxu0 %v2284_v57  ;;  %v2274_v40 = vmul.f32 %v2258_v30, %v2210_v1 }
 0x4e0   :  { %v3292_v19 = vpop.eup %3291  ;;  %v2276_v0 = vmul.f32 %v2260_v9, %v2212_v59 }
 0x4e1   :  { %v2261_v22 = vadd.f32 1.0, %v3292_v19 }
 0x4e2   :  { %v2286_v55 = vpack.c.bf16 %v2276_v0, %v2274_v40 }
 0x4e3   :  { %v2277_v12 = vmul.f32 %v2261_v22, %v2213_v5  ;;  %v3294_v42 = vpop.eup %3293 }
 0x4e4   :  { %v3296_v46 = vpop.eup %3295  ;;  %v2263_v8 = vadd.f32 1.0, %v3294_v42 }
 0x4e5   :  { %v2287_v34 = vpack.c.bf16 %v2277_v12, %v2275_v31  ;;  %v3298_v45 = vpop.eup %3297  ;;  %v2262_v49 = vadd.f32 1.0, %v3296_v46 }
 0x4e6   :  { %v2264_v7 = vadd.f32 1.0, %v3298_v45  ;;  %v2279_v41 = vmul.f32 %v2263_v8, %v2215_v13 }
 0x4e7   :  { %v3300_v60 = vpop.eup %3299  ;;  %2545 = vmatprep.mubr.bf16.mxu0 %v2287_v34  ;;  %v2278_v61 = vmul.f32 %v2262_v49, %v2214_v33 }
 0x4e8   :  { %v2265_v62 = vadd.f32 1.0, %v3300_v60  ;;  %2546 = vmatmul.mubr.bf16.gmra.mxu0 %v2286_v55  ;;  %v2280_v51 = vmul.f32 %v2264_v7, %v2216_v38 }
 0x4ea   :  { %v2281_v63 = vmul.f32 %v2265_v62, %v2217_v10  ;;  %v2288_v54 = vpack.c.bf16 %v2280_v51, %v2278_v61 }
 0x4ec   :  { %v2289_v27 = vpack.c.bf16 %v2281_v63, %v2279_v41 }
 0x4ee   :  { %2555 = vmatprep.mubr.bf16.mxu0 %v2289_v27 }
 0x4f0   :  { %2556 = vmatmul.mubr.bf16.gmra.mxu0 %v2288_v54 }
 0x597   :  { %v2527_v6 = vpop.f32.mrf.mxu0 }
 0x598   :  { %v2528_v4 = vadd.f32 %v2527_v6, %v2326_v37 }
 0x599   :  { %v2529_v35 = vpop.f32.mrf.mxu0 }
 0x59a   :  { %2566 = vst [vmem:[%s4049_s9] sm:$0xff] %v2528_v4  ;;  %v2530_v21 = vadd.f32 %v2529_v35, %v2330_v58 }
 0x59b   :  { %v2531_v3 = vpop.f32.mrf.mxu0 }
 0x59c   :  { %2567 = vst [vmem:[%s4049_s9 + $0x8] sm:$0xff] %v2530_v21  ;;  %v2532_v29 = vadd.f32 %v2531_v3, %v2326_v37 }
 0x59d   :  { %v2533_v2 = vpop.f32.mrf.mxu0 }
 0x59e   :  { %2568 = vst [vmem:[%s4049_s9 + $0x10] sm:$0xff] %v2532_v29  ;;  %v2534_v23 = vadd.f32 %v2533_v2, %v2330_v58 }
 0x59f   :  { %v2537_v25 = vpop.f32.mrf.mxu0 }
 0x5a0   :  { %2569 = vst [vmem:[%s4049_s9 + $0x18] sm:$0xff] %v2534_v23  ;;  %v2538_v44 = vadd.f32 %v2537_v25, %v2326_v37 }
 0x5a1   :  { %v2539_v24 = vpop.f32.mrf.mxu0 }
 0x5a2   :  { %2570 = vst [vmem:[%s4049_s9 + $0x20] sm:$0xff] %v2538_v44  ;;  %v2540_v17 = vadd.f32 %v2539_v24, %v2330_v58 }
 0x5a3   :  { %v2541_v56 = vpop.f32.mrf.mxu0 }
 0x5a4   :  { %2571 = vst [vmem:[%s4049_s9 + $0x28] sm:$0xff] %v2540_v17  ;;  %v2542_v11 = vadd.f32 %v2541_v56, %v2326_v37 }
 0x5a5   :  { %v2543_v28 = vpop.f32.mrf.mxu0 }
 0x5a6   :  { %2572 = vst [vmem:[%s4049_s9 + $0x30] sm:$0xff] %v2542_v11  ;;  %v2544_v52 = vadd.f32 %v2543_v28, %v2330_v58 }
 0x5a8   :  { %v2547_v32 = vpop.f32.mrf.mxu0  ;;  %2573 = vst [vmem:[%s4049_s9 + $0x38] sm:$0xff] %v2544_v52 }
 0x5a9   :  { %v2548_v50 = vadd.f32 %v2547_v32, %v2326_v37 }
 0x5aa   :  { %v2549_v47 = vpop.f32.mrf.mxu0 }
 0x5ab   :  { %2574 = vst [vmem:[%s4049_s9 + $0x40] sm:$0xff] %v2548_v50  ;;  %v2550_v39 = vadd.f32 %v2549_v47, %v2330_v58 }
 0x5ac   :  { %v2551_v36 = vpop.f32.mrf.mxu0 }
 0x5ad   :  { %2575 = vst [vmem:[%s4049_s9 + $0x48] sm:$0xff] %v2550_v39  ;;  %v2552_v15 = vadd.f32 %v2551_v36, %v2326_v37 }
 0x5ae   :  { %v2553_v18 = vpop.f32.mrf.mxu0 }
 0x5af   :  { %2576 = vst [vmem:[%s4049_s9 + $0x50] sm:$0xff] %v2552_v15  ;;  %v2554_v48 = vadd.f32 %v2553_v18, %v2330_v58 }
 0x5b0   :  { %v2557_v14 = vpop.f32.mrf.mxu0 }
 0x5b1   :  { %2577 = vst [vmem:[%s4049_s9 + $0x58] sm:$0xff] %v2554_v48  ;;  %v2558_v20 = vadd.f32 %v2557_v14, %v2326_v37 }
 0x5b2   :  { %v2559_v16 = vpop.f32.mrf.mxu0 }
 0x5b3   :  { %2578 = vst [vmem:[%s4049_s9 + $0x60] sm:$0xff] %v2558_v20  ;;  %v2560_v57 = vadd.f32 %v2559_v16, %v2330_v58 }
 0x5b4   :  { %v2561_v43 = vpop.f32.mrf.mxu0 }
 0x5b5   :  { %2579 = vst [vmem:[%s4049_s9 + $0x68] sm:$0xff] %v2560_v57  ;;  %v2562_v9 = vadd.f32 %v2561_v43, %v2326_v37 }
 0x5b6   :  { %v2563_v19 = vpop.f32.mrf.mxu0 }
 0x5b7   :  { %2580 = vst [vmem:[%s4049_s9 + $0x70] sm:$0xff] %v2562_v9  ;;  %v2564_v30 = vadd.f32 %v2563_v19, %v2330_v58 }
 0x5b9   :  { %2581 = vst [vmem:[%s4049_s9 + $0x78] sm:$0xff] %v2564_v30 }
 0x5ba   :  { %2586 = vsyncpa [#allocation3], 1 }
 0x5bb   :  { %2587 = vsyncpa [#allocation5], 1 }
 0x5bc   :  { %2588 = vsyncpa [#allocation8], 1 }

</bundles_post_ra>
